<compile_context>
chip_gen: v5e
topology: v5e:2x2
jax: 0.10.0
libtpu: 0.0.40
codegen_flags: <defaults>
</compile_context>

<pallas_src>
import jax
import jax.numpy as jnp
from jax.experimental import pallas as pl
from jax.experimental.pallas import tpu as pltpu


def _round_up(x, m):
    return ((x + m - 1) // m) * m


def _ins_cls_kernel(x_ref, w1_ref, b1_ref, w23_ref, b23_ref, o_ref):
    # Layer 1: Linear(1024 -> 512) + ReLU. bf16 operands, f32 accumulation on the MXU.
    h1 = jnp.dot(x_ref[...], w1_ref[...], preferred_element_type=jnp.float32)
    h1 = jnp.maximum(h1 + b1_ref[...], 0.0)

    # Folded Linear(512 -> 256) . Linear(256 -> num_cls): single matmul + sigmoid.
    logits = jnp.dot(h1.astype(w23_ref.dtype), w23_ref[...],
                     preferred_element_type=jnp.float32) + b23_ref[...]
    o_ref[...] = jax.nn.sigmoid(logits).astype(o_ref.dtype)


def ins_cls_forward(x, w1, b1, w2, b2, w3, b3, *, block_rows=256):
    """Forward pass of _InsCls.

    x:  (N, 1024)
    w*: (in_features, out_features)   -- transposed w.r.t. torch Linear.weight
    b*: (1, out_features)
    Returns (N, num_cls) float32.
    """
    n, d_in = x.shape
    d_h1 = w1.shape[1]
    num_cls = w3.shape[1]

    # Fold Linear2 + Linear3 (exact: no nonlinearity between them); do it in f32.
    w3f = w3.astype(jnp.float32)
    w23 = w2.astype(jnp.float32) @ w3f                                  # (512, num_cls)
    b23 = b2.astype(jnp.float32) @ w3f + b3.astype(jnp.float32)         # (1,   num_cls)

    # Pad output columns to a lane-dense width (multiple of 128); caller slices back.
    n_out = _round_up(num_cls, 128)
    if n_out != num_cls:
        w23 = jnp.pad(w23, ((0, 0), (0, n_out - num_cls)))
        b23 = jnp.pad(b23, ((0, 0), (0, n_out - num_cls)))

    # bf16 operands (accumulation stays f32 inside the kernel).
    xb = x.astype(jnp.bfloat16)
    w1b = w1.astype(jnp.bfloat16)
    w23b = w23.astype(jnp.bfloat16)
    b1f = b1.astype(jnp.float32)

    # Batch tiling: pad N up to a multiple of the row tile (ragged last tile handling).
    tm = min(block_rows, _round_up(n, 8))
    n_pad = _round_up(n, tm)
    if n_pad != n:
        xb = jnp.pad(xb, ((0, n_pad - n), (0, 0)))

    out = pl.pallas_call(
        _ins_cls_kernel,
        out_shape=jax.ShapeDtypeStruct((n_pad, n_out), jnp.float32),
        grid=(n_pad // tm,),
        in_specs=[
            pl.BlockSpec((tm, d_in), lambda i: (i, 0)),               # x: streamed tiles
            pl.BlockSpec((d_in, d_h1), lambda i: (0, 0)),             # w1: VMEM-resident
            pl.BlockSpec((1, d_h1), lambda i: (0, 0)),                # b1
            pl.BlockSpec((w23b.shape[0], n_out), lambda i: (0, 0)),   # folded W23
            pl.BlockSpec((1, n_out), lambda i: (0, 0)),               # folded b23
        ],
        out_specs=pl.BlockSpec((tm, n_out), lambda i: (i, 0)),
        compiler_params=pltpu.CompilerParams(
            dimension_semantics=("parallel",),
        ),
    )(xb, w1b, b1f, w23b, b23)

    return out[:n, :num_cls]


def init_params(key, num_cls):
    """Deterministic synthetic init (Kaiming-uniform-ish scale, like torch Linear default)."""
    keys = jax.random.split(key, 6)

    def linear(kw, kb, fan_in, fan_out):
        bound = 1.0 / jnp.sqrt(fan_in)
        w = jax.random.uniform(kw, (fan_in, fan_out), jnp.float32, -bound, bound)
        b = jax.random.uniform(kb, (1, fan_out), jnp.float32, -bound, bound)
        return w, b

    w1, b1 = linear(keys[0], keys[1], 1024, 512)
    w2, b2 = linear(keys[2], keys[3], 512, 256)
    w3, b3 = linear(keys[4], keys[5], 256, num_cls)
    return w1, b1, w2, b2, w3, b3


if __name__ == "__main__":
    key = jax.random.PRNGKey(0)
    k_x, k_p = jax.random.split(key)

    batch = 8
    num_cls = 8

    x = jax.random.normal(k_x, (batch, 1024), jnp.float32)
    w1, b1, w2, b2, w3, b3 = init_params(k_p, num_cls)

    out = ins_cls_forward(x, w1, b1, w2, b2, w3, b3)
    out = jax.block_until_ready(out)
    assert out.shape == (batch, num_cls)

    # 1) Loose check against the exact-semantics f32 reference (3 separate Linears):
    #    only bf16 weight/activation quantization separates the two.
    ref_f32 = jax.nn.sigmoid(
        (jnp.maximum(x @ w1 + b1, 0.0) @ w2 + b2) @ w3 + b3
    )
    assert jnp.allclose(out, ref_f32, atol=5e-2), "mismatch vs f32 reference"

    # 2) Tight check against a reference using the same bf16-quantized, folded weights
    #    (differences are accumulation-order only).
    bf = lambda a: a.astype(jnp.bfloat16).astype(jnp.float32)
    w23_ref = w2 @ w3
    b23_ref = b2 @ w3 + b3
    h1_ref = jnp.maximum(bf(x) @ bf(w1) + b1, 0.0)
    ref_bf16 = jax.nn.sigmoid(bf(h1_ref) @ bf(w23_ref) + b23_ref)
    assert jnp.allclose(out, ref_bf16, atol=2e-3), "mismatch vs bf16-consistent reference"

    print("KERNEL_OK")
</pallas_src>

<mosaic_0001>
module attributes {stable_mosaic.version = 11 : i64} {
  func.func @_ins_cls_kernel(%arg0: i32, %arg1: memref<8x1024xbf16, #tpu.memory_space<vmem>>, %arg2: memref<1024x512xbf16, #tpu.memory_space<vmem>>, %arg3: memref<1x512xf32, #tpu.memory_space<vmem>>, %arg4: memref<512x128xbf16, #tpu.memory_space<vmem>>, %arg5: memref<1x128xf32, #tpu.memory_space<vmem>>, %arg6: memref<8x128xf32, #tpu.memory_space<vmem>>) attributes {dimension_semantics = [#tpu.dimension_semantics<parallel>], iteration_bounds = array<i64: 1>, scalar_prefetch = 0 : i64, scratch_operands = 0 : i64, tpu.core_type = #tpu.core_type<tc>, window_params = [{transform_indices = @transform_0, window_bounds = array<i64: 8, 1024>}, {pipeline_mode = #tpu.pipeline_mode<synchronous>, transform_indices = @transform_1, window_bounds = array<i64: 1024, 512>}, {pipeline_mode = #tpu.pipeline_mode<synchronous>, transform_indices = @transform_2, window_bounds = array<i64: 1, 512>}, {pipeline_mode = #tpu.pipeline_mode<synchronous>, transform_indices = @transform_3, window_bounds = array<i64: 512, 128>}, {pipeline_mode = #tpu.pipeline_mode<synchronous>, transform_indices = @transform_4, window_bounds = array<i64: 1, 128>}, {transform_indices = @transform_5, window_bounds = array<i64: 8, 128>}]} {
    %c0 = arith.constant 0 : index
    %c0_0 = arith.constant 0 : index
    %0 = vector.load %arg1[%c0, %c0_0] : memref<8x1024xbf16, #tpu.memory_space<vmem>>, vector<8x1024xbf16>
    %c0_1 = arith.constant 0 : index
    %c0_2 = arith.constant 0 : index
    %1 = vector.load %arg2[%c0_1, %c0_2] : memref<1024x512xbf16, #tpu.memory_space<vmem>>, vector<1024x512xbf16>
    %cst = arith.constant dense<0.000000e+00> : vector<8x512xf32>
    %2 = tpu.matmul %0, %1, %cst {dimension_numbers = #tpu.dot_dimension_numbers<[1], [0], [0], [1], [0, 0, 1, 1], [], []>} : vector<8x1024xbf16>, vector<1024x512xbf16>, vector<8x512xf32> -> vector<8x512xf32>
    %c0_3 = arith.constant 0 : index
    %c0_4 = arith.constant 0 : index
    %3 = vector.load %arg3[%c0_3, %c0_4] : memref<1x512xf32, #tpu.memory_space<vmem>>, vector<1x512xf32>
    %4 = vector.broadcast %3 : vector<1x512xf32> to vector<8x512xf32>
    %5 = arith.addf %2, %4 : vector<8x512xf32>
    %cst_5 = arith.constant 0.000000e+00 : f32
    %6 = vector.broadcast %cst_5 : f32 to vector<8x512xf32>
    %7 = arith.maximumf %5, %6 : vector<8x512xf32>
    %8 = arith.truncf %7 : vector<8x512xf32> to vector<8x512xbf16>
    %c0_6 = arith.constant 0 : index
    %c0_7 = arith.constant 0 : index
    %9 = vector.load %arg4[%c0_6, %c0_7] : memref<512x128xbf16, #tpu.memory_space<vmem>>, vector<512x128xbf16>
    %cst_8 = arith.constant dense<0.000000e+00> : vector<8x128xf32>
    %10 = tpu.matmul %8, %9, %cst_8 {dimension_numbers = #tpu.dot_dimension_numbers<[1], [0], [0], [1], [0, 0, 1, 1], [], []>} : vector<8x512xbf16>, vector<512x128xbf16>, vector<8x128xf32> -> vector<8x128xf32>
    %c0_9 = arith.constant 0 : index
    %c0_10 = arith.constant 0 : index
    %11 = vector.load %arg5[%c0_9, %c0_10] : memref<1x128xf32, #tpu.memory_space<vmem>>, vector<1x128xf32>
    %12 = vector.broadcast %11 : vector<1x128xf32> to vector<8x128xf32>
    %13 = arith.addf %10, %12 : vector<8x128xf32>
    %14 = arith.negf %13 : vector<8x128xf32>
    %15 = math.exp %14 : vector<8x128xf32>
    %cst_11 = arith.constant 1.000000e+00 : f32
    %16 = vector.broadcast %cst_11 : f32 to vector<8x128xf32>
    %17 = arith.addf %16, %15 : vector<8x128xf32>
    %18 = arith.divf %16, %17 : vector<8x128xf32>
    %c0_12 = arith.constant 0 : index
    %c0_13 = arith.constant 0 : index
    %19 = vector.load %arg6[%c0_12, %c0_13] : memref<8x128xf32, #tpu.memory_space<vmem>>, vector<8x128xf32>
    tpu.vector_store %arg6[%c0_12, %c0_13], %18 {strides = array<i32>} : memref<8x128xf32, #tpu.memory_space<vmem>>, vector<8x128xf32>,
    return
  }
  func.func @transform_0(%arg0: i32) -> (i32, i32) {
    %c0_i32 = arith.constant 0 : i32
    %c0_i32_0 = arith.constant 0 : i32
    return %arg0, %c0_i32 : i32, i32
  }
  func.func @transform_1(%arg0: i32) -> (i32, i32) {
    %c0_i32 = arith.constant 0 : i32
    %c0_i32_0 = arith.constant 0 : i32
    %c0_i32_1 = arith.constant 0 : i32
    return %c0_i32, %c0_i32_0 : i32, i32
  }
  func.func @transform_2(%arg0: i32) -> (i32, i32) {
    %c0_i32 = arith.constant 0 : i32
    %c0_i32_0 = arith.constant 0 : i32
    %c0_i32_1 = arith.constant 0 : i32
    return %c0_i32, %c0_i32_0 : i32, i32
  }
  func.func @transform_3(%arg0: i32) -> (i32, i32) {
    %c0_i32 = arith.constant 0 : i32
    %c0_i32_0 = arith.constant 0 : i32
    %c0_i32_1 = arith.constant 0 : i32
    return %c0_i32, %c0_i32_0 : i32, i32
  }
  func.func @transform_4(%arg0: i32) -> (i32, i32) {
    %c0_i32 = arith.constant 0 : i32
    %c0_i32_0 = arith.constant 0 : i32
    %c0_i32_1 = arith.constant 0 : i32
    return %c0_i32, %c0_i32_0 : i32, i32
  }
  func.func @transform_5(%arg0: i32) -> (i32, i32) {
    %c0_i32 = arith.constant 0 : i32
    %c0_i32_0 = arith.constant 0 : i32
    return %arg0, %c0_i32 : i32, i32
  }
}

</mosaic_0001>

<bundles_post_ra>
// kernel: tpu_custom_call.1
= control target key start
LH: loop header
LB: loop body
LE: loop exit
PB: predicated region body
PF: predicated region fallthrough
CT: control target
= control target key end

     0   :  { %10 = vsyncpa [#allocation3], 0  ;;  %s4145_s0 = inlined_call_operand.hbm [shape: bf16[8,1024], index: 0, kind: input, shape index: {}]   ;;  %s4146_s1 = inlined_call_operand.hbm [shape: bf16[1024,512], index: 1, kind: input, shape index: {}]   ;;  %s4147_s2 = inlined_call_operand.hbm [shape: f32[1,512], index: 2, kind: input, shape index: {}]   ;;  %s4148_s3 = inlined_call_operand.hbm [shape: bf16[512,128], index: 3, kind: input, shape index: {}]   ;;  %s4149_s4 = inlined_call_operand.vmem [shape: f32[1,128], index: 4, kind: input, shape index: {}]   ;;  %s4150_s5 = inlined_call_operand.hbm [shape: f32[8,128], index: 5, kind: output, shape index: {}]  }
   0x1   :  { %11 = vsyncpa [#allocation6], 0 }
   0x2   :  { %12 = vsyncpa [#allocation9], 0  ;;  %s29_s20 = sshll.u32 %s4146_s1, 4  ;;  %s30_s20 = int_to_ptr.hbm [resolvable:$true] %s29_s20 }
   0x3   :  { %13 = vsyncpa [#allocation4], 0  ;;  %s4016_s21 = smov [#allocation5]   ;;  %s19_s25 = sshll.u32 %s4145_s0, 4  ;;  %s20_s25 = int_to_ptr.hbm [resolvable:$true] %s19_s25 }
   0x4   :  { %s31_s22 = sshll.u32 %s4016_s21, 4  ;;  %s4017_s26 = smov 256   ;;  %s32_s22 = int_to_ptr.vmem [resolvable:$true] %s31_s22 }
   0x5   :  { %s4018_s27 = smov 16   ;;  %s4019_s28 = smov [#allocation2]  }
   0x6   :  { %37 = dma.hbm_to_vmem [thread:$0]  %s30_s20, 32768, %s32_s22, [#allocation6], %s4017_s26, %s4017_s26, %s4018_s27  }
   0x7   :  { %s21_s29 = sshll.u32 %s4019_s28, 4  ;;  %s43_s7 = sshll.u32 %s4147_s2, 4  ;;  %s22_s29 = int_to_ptr.vmem [resolvable:$true] %s21_s29  ;;  %s44_s7 = int_to_ptr.hbm [resolvable:$true] %s43_s7 }
   0x8   :  { %24 = dma.hbm_to_vmem [thread:$0]  %s20_s25, 512, %s22_s29, [#allocation3]  }
   0x9   :  { %s53_s9 = sshll.u32 %s4148_s3, 4  ;;  %s4020_s10 = smov [#allocation7]   ;;  %s54_s9 = int_to_ptr.hbm [resolvable:$true] %s53_s9 }
   0xa   :  { %s45_s11 = sshll.u32 %s4020_s10, 4  ;;  %s4021_s0 = smov [#allocation8]   ;;  %s46_s11 = int_to_ptr.vmem [resolvable:$true] %s45_s11 }
   0xb   :  { %48 = dma.hbm_to_vmem [thread:$0]  %s44_s7, 64, %s46_s11, [#allocation6]  }
   0xc   :  { %s55_s12 = sshll.u32 %s4021_s0, 4  ;;  %s4022_s13 = smov 64   ;;  %s56_s12 = int_to_ptr.vmem [resolvable:$true] %s55_s12 }
   0xd   :  { %s4023_s14 = smov 4  }
   0xe   :  { %61 = dma.hbm_to_vmem [thread:$0]  %s54_s9, 4096, %s56_s12, [#allocation9], %s4022_s13, %s4022_s13, %s4023_s14  }
   0xf   :  { %4008 = dma.done.wait [#allocation3], 512  }
  0x10   :  { %4009 = vsyncadd [#allocation3], 4294966784 }
  0x11   :  { %4010 = dma.done.wait [#allocation6], 32832  }
  0x12   :  { %4011 = vsyncadd [#allocation6], 4294934464 }
  0x13   :  { %4012 = dma.done.wait [#allocation9], 4096  }
  0x14   :  { %4013 = vsyncadd [#allocation9], 4294963200  ;;  %v2547_v0 = vld [vmem:[#allocation5 + $0xe0] sm:$0xf]  ;;  %v3616_v1 = vld [vmem:[#allocation5 + $0xec] sm:$0xf0] }
  0x15   :  { %v2675_v2 = vld [vmem:[#allocation5 + $0x1e0] sm:$0xf]  ;;  %v2548_v3 = vor.u32 %v3616_v1, %v2547_v0  ;;  %v3648_v4 = vld [vmem:[#allocation5 + $0x1ec] sm:$0xf0]  ;;  %s2421_s18 = sshll.u32 %s4150_s5, 4  ;;  %s2422_s18 = int_to_ptr.hbm [resolvable:$true] %s2421_s18 }
  0x16   :  { %v2803_v5 = vld [vmem:[#allocation5 + $0x2e0] sm:$0xf]  ;;  %v3680_v6 = vld [vmem:[#allocation5 + $0x2ec] sm:$0xf0]  ;;  %v2676_v7 = vor.u32 %v3648_v4, %v2675_v2 }
  0x17   :  { %v2804_v8 = vor.u32 %v3680_v6, %v2803_v5  ;;  %v2931_v9 = vld [vmem:[#allocation5 + $0x3e0] sm:$0xf]  ;;  %v3712_v10 = vld [vmem:[#allocation5 + $0x3ec] sm:$0xf0]  ;;  %1658 = vmatpush.bf16.msra.mxu0 %v2548_v3 }
  0x18   :  { %v2531_v11 = vld [vmem:[#allocation5 + $0xc0] sm:$0xf]  ;;  %v2932_v12 = vor.u32 %v3712_v10, %v2931_v9  ;;  %v3612_v13 = vld [vmem:[#allocation5 + $0xcc] sm:$0xf0]  ;;  %1671 = vmatpush.bf16.msra.mxu1 %v2676_v7 }
  0x19   :  { %v2659_v14 = vld [vmem:[#allocation5 + $0x1c0] sm:$0xf]  ;;  %v3644_v15 = vld [vmem:[#allocation5 + $0x1cc] sm:$0xf0]  ;;  %1684 = vmatpush.bf16.msra.mxu2 %v2804_v8  ;;  %v2532_v16 = vor.u32 %v3612_v13, %v2531_v11 }
  0x1a   :  { %v2660_v17 = vor.u32 %v3644_v15, %v2659_v14  ;;  %v2787_v18 = vld [vmem:[#allocation5 + $0x2c0] sm:$0xf]  ;;  %v3676_v19 = vld [vmem:[#allocation5 + $0x2cc] sm:$0xf0]  ;;  %1697 = vmatpush.bf16.msra.mxu3 %v2932_v12 }
  0x1b   :  { %v2915_v20 = vld [vmem:[#allocation5 + $0x3c0] sm:$0xf]  ;;  %v2788_v21 = vor.u32 %v3676_v19, %v2787_v18  ;;  %v3708_v22 = vld [vmem:[#allocation5 + $0x3cc] sm:$0xf0]  ;;  %1659 = vmatpush.bf16.msra.mxu0 %v2532_v16 }
  0x1c   :  { %v2515_v23 = vld [vmem:[#allocation5 + $0xa0] sm:$0xf]  ;;  %v3608_v24 = vld [vmem:[#allocation5 + $0xac] sm:$0xf0]  ;;  %v2916_v25 = vor.u32 %v3708_v22, %v2915_v20  ;;  %1672 = vmatpush.bf16.msra.mxu1 %v2660_v17 }
  0x1d   :  { %v2643_v26 = vld [vmem:[#allocation5 + $0x1a0] sm:$0xf]  ;;  %v3640_v27 = vld [vmem:[#allocation5 + $0x1ac] sm:$0xf0]  ;;  %v2516_v29 = vor.u32 %v3608_v24, %v2515_v23  ;;  %1685 = vmatpush.bf16.msra.mxu2 %v2788_v21 }
  0x1e   :  { %v2771_v28 = vld [vmem:[#allocation5 + $0x2a0] sm:$0xf]  ;;  %v3672_v30 = vld [vmem:[#allocation5 + $0x2ac] sm:$0xf0]  ;;  %v2644_v33 = vor.u32 %v3640_v27, %v2643_v26  ;;  %1698 = vmatpush.bf16.msra.mxu3 %v2916_v25 }
  0x1f   :  { %v2899_v31 = vld [vmem:[#allocation5 + $0x3a0] sm:$0xf]  ;;  %v3704_v32 = vld [vmem:[#allocation5 + $0x3ac] sm:$0xf0]  ;;  %v2772_v34 = vor.u32 %v3672_v30, %v2771_v28  ;;  %1660 = vmatpush.bf16.msra.mxu0 %v2516_v29 }
  0x20   :  { %v2499_v35 = vld [vmem:[#allocation5 + $0x80] sm:$0xf]  ;;  %v3604_v36 = vld [vmem:[#allocation5 + $0x8c] sm:$0xf0]  ;;  %v2900_v38 = vor.u32 %v3704_v32, %v2899_v31  ;;  %1673 = vmatpush.bf16.msra.mxu1 %v2644_v33 }
  0x21   :  { %v2627_v37 = vld [vmem:[#allocation5 + $0x180] sm:$0xf]  ;;  %v3636_v39 = vld [vmem:[#allocation5 + $0x18c] sm:$0xf0]  ;;  %v2500_v44 = vor.u32 %v3604_v36, %v2499_v35  ;;  %1686 = vmatpush.bf16.msra.mxu2 %v2772_v34 }
  0x22   :  { %v2755_v40 = vld [vmem:[#allocation5 + $0x280] sm:$0xf]  ;;  %v3668_v41 = vld [vmem:[#allocation5 + $0x28c] sm:$0xf0]  ;;  %v2628_v45 = vor.u32 %v3636_v39, %v2627_v37  ;;  %1699 = vmatpush.bf16.msra.mxu3 %v2900_v38 }
  0x23   :  { %v2883_v42 = vld [vmem:[#allocation5 + $0x380] sm:$0xf]  ;;  %v3700_v43 = vld [vmem:[#allocation5 + $0x38c] sm:$0xf0]  ;;  %v2756_v46 = vor.u32 %v3668_v41, %v2755_v40  ;;  %1661 = vmatpush.bf16.msra.mxu0 %v2500_v44 }
  0x24   :  { %v2483_v47 = vld [vmem:[#allocation5 + $0x60] sm:$0xf]  ;;  %v3600_v48 = vld [vmem:[#allocation5 + $0x6c] sm:$0xf0]  ;;  %v2884_v50 = vor.u32 %v3700_v43, %v2883_v42  ;;  %1674 = vmatpush.bf16.msra.mxu1 %v2628_v45 }
  0x25   :  { %v2611_v49 = vld [vmem:[#allocation5 + $0x160] sm:$0xf]  ;;  %v3632_v51 = vld [vmem:[#allocation5 + $0x16c] sm:$0xf0]  ;;  %v2484_v56 = vor.u32 %v3600_v48, %v2483_v47  ;;  %1687 = vmatpush.bf16.msra.mxu2 %v2756_v46 }
  0x26   :  { %v2739_v52 = vld [vmem:[#allocation5 + $0x260] sm:$0xf]  ;;  %v3664_v53 = vld [vmem:[#allocation5 + $0x26c] sm:$0xf0]  ;;  %v2612_v57 = vor.u32 %v3632_v51, %v2611_v49  ;;  %1700 = vmatpush.bf16.msra.mxu3 %v2884_v50 }
  0x27   :  { %v2867_v54 = vld [vmem:[#allocation5 + $0x360] sm:$0xf]  ;;  %v3696_v55 = vld [vmem:[#allocation5 + $0x36c] sm:$0xf0]  ;;  %v2740_v58 = vor.u32 %v3664_v53, %v2739_v52  ;;  %1662 = vmatpush.bf16.msra.mxu0 %v2484_v56 }
  0x28   :  { %v2467_v59 = vld [vmem:[#allocation5 + $0x40] sm:$0xf]  ;;  %v3596_v60 = vld [vmem:[#allocation5 + $0x4c] sm:$0xf0]  ;;  %v2868_v62 = vor.u32 %v3696_v55, %v2867_v54  ;;  %1675 = vmatpush.bf16.msra.mxu1 %v2612_v57 }
  0x29   :  { %v2595_v61 = vld [vmem:[#allocation5 + $0x140] sm:$0xf]  ;;  %v3628_v63 = vld [vmem:[#allocation5 + $0x14c] sm:$0xf0]  ;;  %v2468_v4 = vor.u32 %v3596_v60, %v2467_v59  ;;  %1688 = vmatpush.bf16.msra.mxu2 %v2740_v58 }
  0x2a   :  { %v2723_v0 = vld [vmem:[#allocation5 + $0x240] sm:$0xf]  ;;  %v3660_v1 = vld [vmem:[#allocation5 + $0x24c] sm:$0xf0]  ;;  %v2596_v5 = vor.u32 %v3628_v63, %v2595_v61  ;;  %1701 = vmatpush.bf16.msra.mxu3 %v2868_v62 }
  0x2b   :  { %v2851_v2 = vld [vmem:[#allocation5 + $0x340] sm:$0xf]  ;;  %v3692_v3 = vld [vmem:[#allocation5 + $0x34c] sm:$0xf0]  ;;  %v2724_v6 = vor.u32 %v3660_v1, %v2723_v0  ;;  %1663 = vmatpush.bf16.msra.mxu0 %v2468_v4 }
  0x2c   :  { %v2451_v7 = vld [vmem:[#allocation5 + $0x20] sm:$0xf]  ;;  %v3592_v8 = vld [vmem:[#allocation5 + $0x2c] sm:$0xf0]  ;;  %v2852_v10 = vor.u32 %v3692_v3, %v2851_v2  ;;  %1676 = vmatpush.bf16.msra.mxu1 %v2596_v5  ;;  %v81_v2 = vld [vmem:[#allocation2 + $0x8] sm:$0xff] }
  0x2d   :  { %v2579_v9 = vld [vmem:[#allocation5 + $0x120] sm:$0xf]  ;;  %v3624_v11 = vld [vmem:[#allocation5 + $0x12c] sm:$0xf0]  ;;  %v2452_v16 = vor.u32 %v3592_v8, %v2451_v7  ;;  %1689 = vmatpush.bf16.msra.mxu2 %v2724_v6  ;;  %v356_v8 = vunpack.c.l.b16 %v81_v2 }
  0x2e   :  { %v2707_v12 = vld [vmem:[#allocation5 + $0x220] sm:$0xf]  ;;  %v3656_v13 = vld [vmem:[#allocation5 + $0x22c] sm:$0xf0]  ;;  %v2580_v19 = vor.u32 %v3624_v11, %v2579_v9  ;;  %1702 = vmatpush.bf16.msra.mxu3 %v2852_v10  ;;  %v357_v10 = vunpack.c.h.b16 %v81_v2 }
  0x2f   :  { %v2835_v14 = vld [vmem:[#allocation5 + $0x320] sm:$0xf]  ;;  %v3688_v15 = vld [vmem:[#allocation5 + $0x32c] sm:$0xf0]  ;;  %v2708_v20 = vor.u32 %v3656_v13, %v2707_v12  ;;  %1664 = vmatpush.bf16.msra.mxu0 %v2452_v16 }
  0x30   :  { %v2435_v17 = vld [vmem:[#allocation5] sm:$0xf]  ;;  %v3588_v18 = vld [vmem:[#allocation5 + $0xc] sm:$0xf0]  ;;  %v2836_v24 = vor.u32 %v3688_v15, %v2835_v14  ;;  %1677 = vmatpush.bf16.msra.mxu1 %v2580_v19 }
  0x31   :  { %v2563_v21 = vld [vmem:[#allocation5 + $0x100] sm:$0xf]  ;;  %v3620_v22 = vld [vmem:[#allocation5 + $0x10c] sm:$0xf0]  ;;  %v2436_v31 = vor.u32 %v3588_v18, %v2435_v17  ;;  %1690 = vmatpush.bf16.msra.mxu2 %v2708_v20  ;;  %v4067_v18 = vpack.c.b16 %v356_v8, %v356_v8  ;;  %v4071_v20 = vpack.c.b16 %v357_v10, %v357_v10  ;;  %v3614_v8 = vld [vmem:[#allocation5 + $0xe4] sm:$0xf] }
  0x32   :  { %v2691_v23 = vld [vmem:[#allocation5 + $0x200] sm:$0xf]  ;;  %v3652_v25 = vld [vmem:[#allocation5 + $0x20c] sm:$0xf0]  ;;  %v2564_v35 = vor.u32 %v3620_v22, %v2563_v21  ;;  %1703 = vmatpush.bf16.msra.mxu3 %v2836_v24  ;;  %v3646_v10 = vld [vmem:[#allocation5 + $0x1e4] sm:$0xf] }
  0x33   :  { %v2819_v26 = vld [vmem:[#allocation5 + $0x300] sm:$0xf]  ;;  %v3684_v27 = vld [vmem:[#allocation5 + $0x30c] sm:$0xf0]  ;;  %v2692_v36 = vor.u32 %v3652_v25, %v2691_v23  ;;  %1665 = vmatpush.bf16.msra.mxu0 %v2436_v31 }
  0x34   :  { %v3059_v28 = vld [vmem:[#allocation5 + $0x4e0] sm:$0xf]  ;;  %v3744_v29 = vld [vmem:[#allocation5 + $0x4ec] sm:$0xf0]  ;;  %v2820_v39 = vor.u32 %v3684_v27, %v2819_v26  ;;  %1678 = vmatpush.bf16.msra.mxu1 %v2564_v35 }
  0x35   :  { %v3187_v30 = vld [vmem:[#allocation5 + $0x5e0] sm:$0xf]  ;;  %v3776_v32 = vld [vmem:[#allocation5 + $0x5ec] sm:$0xf0]  ;;  %v3060_v40 = vor.u32 %v3744_v29, %v3059_v28  ;;  %1691 = vmatpush.bf16.msra.mxu2 %v2692_v36 }
  0x36   :  { %v3315_v33 = vld [vmem:[#allocation5 + $0x6e0] sm:$0xf]  ;;  %v3808_v34 = vld [vmem:[#allocation5 + $0x6ec] sm:$0xf0]  ;;  %v3188_v41 = vor.u32 %v3776_v32, %v3187_v30  ;;  %1704 = vmatpush.bf16.msra.mxu3 %v2820_v39 }
  0x37   :  { %v3443_v37 = vld [vmem:[#allocation5 + $0x7e0] sm:$0xf]  ;;  %v3840_v38 = vld [vmem:[#allocation5 + $0x7ec] sm:$0xf0]  ;;  %v3316_v42 = vor.u32 %v3808_v34, %v3315_v33  ;;  %1710 = vmatpush.bf16.msrb.mxu0 %v3060_v40 }
  0x38   :  { %v3043_v43 = vld [vmem:[#allocation5 + $0x4c0] sm:$0xf]  ;;  %v3740_v44 = vld [vmem:[#allocation5 + $0x4cc] sm:$0xf0]  ;;  %v3444_v46 = vor.u32 %v3840_v38, %v3443_v37  ;;  %1723 = vmatpush.bf16.msrb.mxu1 %v3188_v41  ;;  %1692 = vmatmul.bf16.vlgmr.msra.gmra.mxu2 %v4067_v18 }
  0x39   :  { %v3171_v45 = vld [vmem:[#allocation5 + $0x5c0] sm:$0xf]  ;;  %v3772_v47 = vld [vmem:[#allocation5 + $0x5cc] sm:$0xf0]  ;;  %v3044_v52 = vor.u32 %v3740_v44, %v3043_v43  ;;  %1736 = vmatpush.bf16.msrb.mxu2 %v3316_v42  ;;  %1705 = vmatmul.bf16.vlgmr.msra.gmra.mxu3 %v4071_v20 }
  0x3a   :  { %v3299_v48 = vld [vmem:[#allocation5 + $0x6c0] sm:$0xf]  ;;  %v3804_v49 = vld [vmem:[#allocation5 + $0x6cc] sm:$0xf0]  ;;  %v3172_v54 = vor.u32 %v3772_v47, %v3171_v45  ;;  %1749 = vmatpush.bf16.msrb.mxu3 %v3444_v46 }
  0x3b   :  { %v3427_v50 = vld [vmem:[#allocation5 + $0x7c0] sm:$0xf]  ;;  %v3836_v51 = vld [vmem:[#allocation5 + $0x7cc] sm:$0xf0]  ;;  %v3300_v55 = vor.u32 %v3804_v49, %v3299_v48  ;;  %1711 = vmatpush.bf16.msrb.mxu0 %v3044_v52 }
  0x3c   :  { %v3027_v53 = vld [vmem:[#allocation5 + $0x4a0] sm:$0xf]  ;;  %v3736_v56 = vld [vmem:[#allocation5 + $0x4ac] sm:$0xf0]  ;;  %v3428_v59 = vor.u32 %v3836_v51, %v3427_v50  ;;  %1724 = vmatpush.bf16.msrb.mxu1 %v3172_v54 }
  0x3d   :  { %v3155_v57 = vld [vmem:[#allocation5 + $0x5a0] sm:$0xf]  ;;  %v3768_v58 = vld [vmem:[#allocation5 + $0x5ac] sm:$0xf0]  ;;  %v3028_v0 = vor.u32 %v3736_v56, %v3027_v53  ;;  %1737 = vmatpush.bf16.msrb.mxu2 %v3300_v55 }
  0x3e   :  { %v3283_v60 = vld [vmem:[#allocation5 + $0x6a0] sm:$0xf]  ;;  %v3800_v61 = vld [vmem:[#allocation5 + $0x6ac] sm:$0xf0]  ;;  %v3156_v1 = vor.u32 %v3768_v58, %v3155_v57  ;;  %1750 = vmatpush.bf16.msrb.mxu3 %v3428_v59 }
  0x3f   :  { %v3411_v62 = vld [vmem:[#allocation5 + $0x7a0] sm:$0xf]  ;;  %v3832_v63 = vld [vmem:[#allocation5 + $0x7ac] sm:$0xf0]  ;;  %v3284_v4 = vor.u32 %v3800_v61, %v3283_v60  ;;  %1712 = vmatpush.bf16.msrb.mxu0 %v3028_v0 }
  0x40   :  { %v80_v3 = vld [vmem:[#allocation2] sm:$0xff]  ;;  %v3732_v6 = vld [vmem:[#allocation5 + $0x48c] sm:$0xf0]  ;;  %v3412_v11 = vor.u32 %v3832_v63, %v3411_v62  ;;  %1725 = vmatpush.bf16.msrb.mxu1 %v3156_v1 }
  0x41   :  { %v3011_v5 = vld [vmem:[#allocation5 + $0x480] sm:$0xf]  ;;  %v354_v9 = vunpack.c.l.b16 %v80_v3  ;;  %v3764_v12 = vld [vmem:[#allocation5 + $0x58c] sm:$0xf0]  ;;  %v355_v15 = vunpack.c.h.b16 %v80_v3  ;;  %1738 = vmatpush.bf16.msrb.mxu2 %v3284_v4  ;;  %v83_v3 = vld [vmem:[#allocation2 + $0x18] sm:$0xff] }
  0x42   :  { %v3139_v7 = vld [vmem:[#allocation5 + $0x580] sm:$0xf]  ;;  %v3796_v14 = vld [vmem:[#allocation5 + $0x68c] sm:$0xf0]  ;;  %v3012_v21 = vor.u32 %v3732_v6, %v3011_v5  ;;  %1751 = vmatpush.bf16.msrb.mxu3 %v3412_v11 }
  0x43   :  { %v3267_v13 = vld [vmem:[#allocation5 + $0x680] sm:$0xf]  ;;  %v3828_v17 = vld [vmem:[#allocation5 + $0x78c] sm:$0xf0]  ;;  %v4069_v19 = vpack.c.b16 %v354_v9, %v354_v9  ;;  %v4073_v22 = vpack.c.b16 %v355_v15, %v355_v15  ;;  %v3140_v23 = vor.u32 %v3764_v12, %v3139_v7  ;;  %v2549_v9 = vld [vmem:[#allocation5 + $0xf0] sm:$0xf0]  ;;  %v360_v15 = vunpack.c.l.b16 %v83_v3 }
  0x44   :  { %v3395_v16 = vld [vmem:[#allocation5 + $0x780] sm:$0xf]  ;;  %v3268_v24 = vor.u32 %v3796_v14, %v3267_v13  ;;  %v3728_v26 = vld [vmem:[#allocation5 + $0x46c] sm:$0xf0]  ;;  %1713 = vmatpush.bf16.msrb.mxu0 %v3012_v21  ;;  %v2677_v12 = vld [vmem:[#allocation5 + $0x1f0] sm:$0xf0] }
  0x45   :  { %v2995_v25 = vld [vmem:[#allocation5 + $0x460] sm:$0xf]  ;;  %v3396_v28 = vor.u32 %v3828_v17, %v3395_v16  ;;  %v3760_v29 = vld [vmem:[#allocation5 + $0x56c] sm:$0xf0]  ;;  %1666 = vmatmul.bf16.vlgmr.msra.gmra.mxu0 %v4069_v19  ;;  %1679 = vmatmul.bf16.vlgmr.msra.gmra.mxu1 %v4073_v22  ;;  %v3678_v13 = vld [vmem:[#allocation5 + $0x2e4] sm:$0xf] }
  0x46   :  { %v3123_v27 = vld [vmem:[#allocation5 + $0x560] sm:$0xf]  ;;  %v3792_v31 = vld [vmem:[#allocation5 + $0x66c] sm:$0xf0]  ;;  %v2996_v34 = vor.u32 %v3728_v26, %v2995_v25  ;;  %1726 = vmatpush.bf16.msrb.mxu1 %v3140_v23  ;;  %1739 = vmatpush.bf16.msrb.mxu2 %v3268_v24  ;;  %v2805_v14 = vld [vmem:[#allocation5 + $0x2f0] sm:$0xf0]  ;;  %v361_v25 = vunpack.c.h.b16 %v83_v3 }
  0x47   :  { %v3251_v30 = vld [vmem:[#allocation5 + $0x660] sm:$0xf]  ;;  %v3824_v33 = vld [vmem:[#allocation5 + $0x76c] sm:$0xf0]  ;;  %v3124_v35 = vor.u32 %v3760_v29, %v3123_v27  ;;  %1752 = vmatpush.bf16.msrb.mxu3 %v3396_v28  ;;  %v3710_v21 = vld [vmem:[#allocation5 + $0x3e4] sm:$0xf]  ;;  %v2552_v27 = vor.u32 %v3614_v8, %v2549_v9  ;;  %v2680_v29 = vor.u32 %v3646_v10, %v2677_v12 }
  0x48   :  { %v3379_v32 = vld [vmem:[#allocation5 + $0x760] sm:$0xf]  ;;  %v3252_v36 = vor.u32 %v3792_v31, %v3251_v30  ;;  %v3724_v38 = vld [vmem:[#allocation5 + $0x44c] sm:$0xf0]  ;;  %1714 = vmatpush.bf16.msrb.mxu0 %v2996_v34  ;;  %v2933_v23 = vld [vmem:[#allocation5 + $0x3f0] sm:$0xf0]  ;;  %v2808_v30 = vor.u32 %v3678_v13, %v2805_v14 }
  0x49   :  { %v2979_v37 = vld [vmem:[#allocation5 + $0x440] sm:$0xf]  ;;  %v3380_v40 = vor.u32 %v3824_v33, %v3379_v32  ;;  %v3756_v41 = vld [vmem:[#allocation5 + $0x54c] sm:$0xf0]  ;;  %v3610_v31 = vld [vmem:[#allocation5 + $0xc4] sm:$0xf]  ;;  %v2936_v34 = vor.u32 %v3710_v21, %v2933_v23 }
  0x4a   :  { %v3107_v39 = vld [vmem:[#allocation5 + $0x540] sm:$0xf]  ;;  %v3788_v43 = vld [vmem:[#allocation5 + $0x64c] sm:$0xf0]  ;;  %v2980_v46 = vor.u32 %v3724_v38, %v2979_v37  ;;  %1727 = vmatpush.bf16.msrb.mxu1 %v3124_v35  ;;  %1740 = vmatpush.bf16.msrb.mxu2 %v3252_v36  ;;  %v2533_v32 = vld [vmem:[#allocation5 + $0xd0] sm:$0xf0]  ;;  %v4079_v38 = vpack.c.b16 %v360_v15, %v360_v15 }
  0x4b   :  { %v3235_v42 = vld [vmem:[#allocation5 + $0x640] sm:$0xf]  ;;  %v3820_v45 = vld [vmem:[#allocation5 + $0x74c] sm:$0xf0]  ;;  %v3108_v47 = vor.u32 %v3756_v41, %v3107_v39  ;;  %1753 = vmatpush.bf16.msrb.mxu3 %v3380_v40  ;;  %v3642_v33 = vld [vmem:[#allocation5 + $0x1c4] sm:$0xf] }
  0x4c   :  { %v3363_v44 = vld [vmem:[#allocation5 + $0x740] sm:$0xf]  ;;  %v3236_v48 = vor.u32 %v3788_v43, %v3235_v42  ;;  %v3720_v50 = vld [vmem:[#allocation5 + $0x42c] sm:$0xf0]  ;;  %1715 = vmatpush.bf16.msrb.mxu0 %v2980_v46  ;;  %v2661_v35 = vld [vmem:[#allocation5 + $0x1d0] sm:$0xf0]  ;;  %v4083_v42 = vpack.c.b16 %v361_v25, %v361_v25  ;;  %v2536_v43 = vor.u32 %v3610_v31, %v2533_v32 }
  0x4d   :  { %v2963_v49 = vld [vmem:[#allocation5 + $0x420] sm:$0xf]  ;;  %v3364_v52 = vor.u32 %v3820_v45, %v3363_v44  ;;  %v3752_v53 = vld [vmem:[#allocation5 + $0x52c] sm:$0xf0]  ;;  %v3674_v36 = vld [vmem:[#allocation5 + $0x2c4] sm:$0xf]  ;;  %v2664_v45 = vor.u32 %v3642_v33, %v2661_v35 }
  0x4e   :  { %v3091_v51 = vld [vmem:[#allocation5 + $0x520] sm:$0xf]  ;;  %v3784_v55 = vld [vmem:[#allocation5 + $0x62c] sm:$0xf0]  ;;  %v2964_v59 = vor.u32 %v3720_v50, %v2963_v49  ;;  %1728 = vmatpush.bf16.msrb.mxu1 %v3108_v47  ;;  %1741 = vmatpush.bf16.msrb.mxu2 %v3236_v48  ;;  %v2789_v37 = vld [vmem:[#allocation5 + $0x2d0] sm:$0xf0] }
  0x4f   :  { %v3219_v54 = vld [vmem:[#allocation5 + $0x620] sm:$0xf]  ;;  %v3816_v57 = vld [vmem:[#allocation5 + $0x72c] sm:$0xf0]  ;;  %v3092_v63 = vor.u32 %v3752_v53, %v3091_v51  ;;  %1754 = vmatpush.bf16.msrb.mxu3 %v3364_v52  ;;  %v3706_v39 = vld [vmem:[#allocation5 + $0x3c4] sm:$0xf]  ;;  %v2792_v46 = vor.u32 %v3674_v36, %v2789_v37 }
  0x50   :  { %v3347_v56 = vld [vmem:[#allocation5 + $0x720] sm:$0xf]  ;;  %v3716_v60 = vld [vmem:[#allocation5 + $0x40c] sm:$0xf0]  ;;  %v3220_v0 = vor.u32 %v3784_v55, %v3219_v54  ;;  %1716 = vmatpush.bf16.msrb.mxu0 %v2964_v59  ;;  %v2917_v40 = vld [vmem:[#allocation5 + $0x3d0] sm:$0xf0] }
  0x51   :  { %v2947_v58 = vld [vmem:[#allocation5 + $0x400] sm:$0xf]  ;;  %v3748_v62 = vld [vmem:[#allocation5 + $0x50c] sm:$0xf0]  ;;  %v3348_v4 = vor.u32 %v3816_v57, %v3347_v56  ;;  %v3606_v47 = vld [vmem:[#allocation5 + $0xa4] sm:$0xf]  ;;  %v2920_v50 = vor.u32 %v3706_v39, %v2917_v40 }
  0x52   :  { %v3075_v61 = vld [vmem:[#allocation5 + $0x500] sm:$0xf]  ;;  %v3780_v2 = vld [vmem:[#allocation5 + $0x60c] sm:$0xf0]  ;;  %v2948_v11 = vor.u32 %v3716_v60, %v2947_v58  ;;  %1729 = vmatpush.bf16.msrb.mxu1 %v3092_v63  ;;  %1742 = vmatpush.bf16.msrb.mxu2 %v3220_v0  ;;  %v2517_v48 = vld [vmem:[#allocation5 + $0xb0] sm:$0xf0] }
  0x53   :  { %v3203_v1 = vld [vmem:[#allocation5 + $0x600] sm:$0xf]  ;;  %v3812_v6 = vld [vmem:[#allocation5 + $0x70c] sm:$0xf0]  ;;  %v3076_v16 = vor.u32 %v3748_v62, %v3075_v61  ;;  %1755 = vmatpush.bf16.msrb.mxu3 %v3348_v4  ;;  %v3638_v49 = vld [vmem:[#allocation5 + $0x1a4] sm:$0xf]  ;;  %v2520_v56 = vor.u32 %v3606_v47, %v2517_v48 }
  0x54   :  { %v3331_v5 = vld [vmem:[#allocation5 + $0x700] sm:$0xf]  ;;  %v82_v7 = vld [vmem:[#allocation2 + $0x10] sm:$0xff]  ;;  %v3204_v17 = vor.u32 %v3780_v2, %v3203_v1  ;;  %1717 = vmatpush.bf16.msrb.mxu0 %v2948_v11  ;;  %v3670_v52 = vld [vmem:[#allocation5 + $0x2a4] sm:$0xf] }
  0x55   :  { %v358_v24 = vunpack.c.l.b16 %v82_v7  ;;  %v3332_v26 = vor.u32 %v3812_v6, %v3331_v5  ;;  %v359_v28 = vunpack.c.h.b16 %v82_v7  ;;  %v2645_v51 = vld [vmem:[#allocation5 + $0x1b0] sm:$0xf0]  ;;  %v3702_v54 = vld [vmem:[#allocation5 + $0x3a4] sm:$0xf] }
  0x56   :  { %1730 = vmatpush.bf16.msrb.mxu1 %v3076_v16  ;;  %1743 = vmatpush.bf16.msrb.mxu2 %v3204_v17  ;;  %v2773_v53 = vld [vmem:[#allocation5 + $0x2b0] sm:$0xf0]  ;;  %v2648_v57 = vor.u32 %v3638_v49, %v2645_v51  ;;  %v3602_v59 = vld [vmem:[#allocation5 + $0x84] sm:$0xf] }
  0x57   :  { %v4081_v41 = vpack.c.b16 %v358_v24, %v358_v24  ;;  %1756 = vmatpush.bf16.msrb.mxu3 %v3332_v26  ;;  %v4085_v44 = vpack.c.b16 %v359_v28, %v359_v28  ;;  %v2901_v55 = vld [vmem:[#allocation5 + $0x3b0] sm:$0xf0]  ;;  %v2776_v58 = vor.u32 %v3670_v52, %v2773_v53  ;;  %v3634_v61 = vld [vmem:[#allocation5 + $0x184] sm:$0xf] }
  0x58   :  { %1762 = vmatpush.bf16.msra.mxu0 %v2552_v27  ;;  %v2501_v60 = vld [vmem:[#allocation5 + $0x90] sm:$0xf0]  ;;  %v2904_v62 = vor.u32 %v3702_v54, %v2901_v55  ;;  %v3666_v0 = vld [vmem:[#allocation5 + $0x284] sm:$0xf] }
  0x59   :  { %1744 = vmatmul.bf16.vlgmr.msrb.gmra.mxu2 %v4079_v38  ;;  %1718 = vmatmul.bf16.vlgmr.msrb.gmra.mxu0 %v4081_v41  ;;  %v2629_v63 = vld [vmem:[#allocation5 + $0x190] sm:$0xf0]  ;;  %v3698_v2 = vld [vmem:[#allocation5 + $0x384] sm:$0xf]  ;;  %v2504_v4 = vor.u32 %v3602_v59, %v2501_v60 }
  0x5a   :  { %1775 = vmatpush.bf16.msra.mxu1 %v2680_v29  ;;  %1788 = vmatpush.bf16.msra.mxu2 %v2808_v30  ;;  %v2757_v1 = vld [vmem:[#allocation5 + $0x290] sm:$0xf0]  ;;  %v2632_v5 = vor.u32 %v3634_v61, %v2629_v63  ;;  %v3598_v7 = vld [vmem:[#allocation5 + $0x64] sm:$0xf] }
  0x5b   :  { %1801 = vmatpush.bf16.msra.mxu3 %v2936_v34  ;;  %1731 = vmatmul.bf16.vlgmr.msrb.gmra.mxu1 %v4085_v44  ;;  %v2885_v3 = vld [vmem:[#allocation5 + $0x390] sm:$0xf0]  ;;  %v2760_v6 = vor.u32 %v3666_v0, %v2757_v1  ;;  %v3630_v9 = vld [vmem:[#allocation5 + $0x164] sm:$0xf] }
  0x5c   :  { %1757 = vmatmul.bf16.vlgmr.msrb.gmra.mxu3 %v4083_v42  ;;  %1763 = vmatpush.bf16.msra.mxu0 %v2536_v43  ;;  %v2485_v8 = vld [vmem:[#allocation5 + $0x70] sm:$0xf0]  ;;  %v2888_v10 = vor.u32 %v3698_v2, %v2885_v3  ;;  %v3662_v12 = vld [vmem:[#allocation5 + $0x264] sm:$0xf] }
  0x5d   :  { %v2613_v11 = vld [vmem:[#allocation5 + $0x170] sm:$0xf0]  ;;  %v3694_v14 = vld [vmem:[#allocation5 + $0x364] sm:$0xf]  ;;  %v2488_v16 = vor.u32 %v3598_v7, %v2485_v8 }
  0x5e   :  { %1776 = vmatpush.bf16.msra.mxu1 %v2664_v45  ;;  %1789 = vmatpush.bf16.msra.mxu2 %v2792_v46  ;;  %v2741_v13 = vld [vmem:[#allocation5 + $0x270] sm:$0xf0]  ;;  %v2616_v17 = vor.u32 %v3630_v9, %v2613_v11  ;;  %v3594_v23 = vld [vmem:[#allocation5 + $0x44] sm:$0xf] }
  0x5f   :  { %1802 = vmatpush.bf16.msra.mxu3 %v2920_v50  ;;  %v2869_v15 = vld [vmem:[#allocation5 + $0x370] sm:$0xf0]  ;;  %v2744_v21 = vor.u32 %v3662_v12, %v2741_v13  ;;  %v3626_v25 = vld [vmem:[#allocation5 + $0x144] sm:$0xf] }
  0x60   :  { %1764 = vmatpush.bf16.msra.mxu0 %v2520_v56  ;;  %v2469_v24 = vld [vmem:[#allocation5 + $0x50] sm:$0xf0]  ;;  %v2872_v26 = vor.u32 %v3694_v14, %v2869_v15  ;;  %v3658_v28 = vld [vmem:[#allocation5 + $0x244] sm:$0xf] }
  0x61   :  { %v2597_v27 = vld [vmem:[#allocation5 + $0x150] sm:$0xf0]  ;;  %v3690_v30 = vld [vmem:[#allocation5 + $0x344] sm:$0xf]  ;;  %v2472_v32 = vor.u32 %v3594_v23, %v2469_v24 }
  0x62   :  { %1777 = vmatpush.bf16.msra.mxu1 %v2648_v57  ;;  %1790 = vmatpush.bf16.msra.mxu2 %v2776_v58  ;;  %v2725_v29 = vld [vmem:[#allocation5 + $0x250] sm:$0xf0]  ;;  %v2600_v33 = vor.u32 %v3626_v25, %v2597_v27  ;;  %v3590_v35 = vld [vmem:[#allocation5 + $0x24] sm:$0xf] }
  0x63   :  { %1803 = vmatpush.bf16.msra.mxu3 %v2904_v62  ;;  %v2853_v31 = vld [vmem:[#allocation5 + $0x350] sm:$0xf0]  ;;  %v2728_v34 = vor.u32 %v3658_v28, %v2725_v29  ;;  %v3622_v37 = vld [vmem:[#allocation5 + $0x124] sm:$0xf] }
  0x64   :  { %1765 = vmatpush.bf16.msra.mxu0 %v2504_v4  ;;  %v2453_v36 = vld [vmem:[#allocation5 + $0x30] sm:$0xf0]  ;;  %v2856_v39 = vor.u32 %v3690_v30, %v2853_v31  ;;  %v3654_v43 = vld [vmem:[#allocation5 + $0x224] sm:$0xf] }
  0x65   :  { %v2581_v40 = vld [vmem:[#allocation5 + $0x130] sm:$0xf0]  ;;  %v3686_v46 = vld [vmem:[#allocation5 + $0x324] sm:$0xf]  ;;  %v2456_v48 = vor.u32 %v3590_v35, %v2453_v36 }
  0x66   :  { %1778 = vmatpush.bf16.msra.mxu1 %v2632_v5  ;;  %1791 = vmatpush.bf16.msra.mxu2 %v2760_v6  ;;  %v2709_v45 = vld [vmem:[#allocation5 + $0x230] sm:$0xf0]  ;;  %v3586_v49 = vld [vmem:[#allocation5 + $0x4] sm:$0xf]  ;;  %v2584_v51 = vor.u32 %v3622_v37, %v2581_v40 }
  0x67   :  { %1804 = vmatpush.bf16.msra.mxu3 %v2888_v10  ;;  %v2837_v47 = vld [vmem:[#allocation5 + $0x330] sm:$0xf0]  ;;  %v2712_v52 = vor.u32 %v3654_v43, %v2709_v45  ;;  %v3618_v53 = vld [vmem:[#allocation5 + $0x104] sm:$0xf] }
  0x68   :  { %1766 = vmatpush.bf16.msra.mxu0 %v2488_v16  ;;  %v2437_v50 = vld [vmem:[#allocation5 + $0x10] sm:$0xf0]  ;;  %v3650_v55 = vld [vmem:[#allocation5 + $0x204] sm:$0xf]  ;;  %v2840_v56 = vor.u32 %v3686_v46, %v2837_v47 }
  0x69   :  { %v2565_v54 = vld [vmem:[#allocation5 + $0x110] sm:$0xf0]  ;;  %v3682_v58 = vld [vmem:[#allocation5 + $0x304] sm:$0xf]  ;;  %v2440_v63 = vor.u32 %v3586_v49, %v2437_v50 }
  0x6a   :  { %1779 = vmatpush.bf16.msra.mxu1 %v2616_v17  ;;  %1792 = vmatpush.bf16.msra.mxu2 %v2744_v21  ;;  %v2693_v57 = vld [vmem:[#allocation5 + $0x210] sm:$0xf0]  ;;  %v3742_v60 = vld [vmem:[#allocation5 + $0x4e4] sm:$0xf]  ;;  %v2568_v3 = vor.u32 %v3618_v53, %v2565_v54 }
  0x6b   :  { %1805 = vmatpush.bf16.msra.mxu3 %v2872_v26  ;;  %v2821_v59 = vld [vmem:[#allocation5 + $0x310] sm:$0xf0]  ;;  %v3774_v62 = vld [vmem:[#allocation5 + $0x5e4] sm:$0xf]  ;;  %v2696_v4 = vor.u32 %v3650_v55, %v2693_v57 }
  0x6c   :  { %1767 = vmatpush.bf16.msra.mxu0 %v2472_v32  ;;  %v3061_v61 = vld [vmem:[#allocation5 + $0x4f0] sm:$0xf0]  ;;  %v3806_v1 = vld [vmem:[#allocation5 + $0x6e4] sm:$0xf]  ;;  %v2824_v7 = vor.u32 %v3682_v58, %v2821_v59 }
  0x6d   :  { %v3189_v0 = vld [vmem:[#allocation5 + $0x5f0] sm:$0xf0]  ;;  %v3838_v5 = vld [vmem:[#allocation5 + $0x7e4] sm:$0xf]  ;;  %v3064_v8 = vor.u32 %v3742_v60, %v3061_v61 }
  0x6e   :  { %1780 = vmatpush.bf16.msra.mxu1 %v2600_v33  ;;  %1793 = vmatpush.bf16.msra.mxu2 %v2728_v34  ;;  %v3317_v2 = vld [vmem:[#allocation5 + $0x6f0] sm:$0xf0]  ;;  %v3192_v9 = vor.u32 %v3774_v62, %v3189_v0  ;;  %v3738_v11 = vld [vmem:[#allocation5 + $0x4c4] sm:$0xf] }
  0x6f   :  { %1806 = vmatpush.bf16.msra.mxu3 %v2856_v39  ;;  %v3445_v6 = vld [vmem:[#allocation5 + $0x7f0] sm:$0xf0]  ;;  %v3320_v10 = vor.u32 %v3806_v1, %v3317_v2  ;;  %v3770_v13 = vld [vmem:[#allocation5 + $0x5c4] sm:$0xf] }
  0x70   :  { %1768 = vmatpush.bf16.msra.mxu0 %v2456_v48  ;;  %v3045_v12 = vld [vmem:[#allocation5 + $0x4d0] sm:$0xf0]  ;;  %v3448_v14 = vor.u32 %v3838_v5, %v3445_v6  ;;  %v3802_v16 = vld [vmem:[#allocation5 + $0x6c4] sm:$0xf] }
  0x71   :  { %v3173_v15 = vld [vmem:[#allocation5 + $0x5d0] sm:$0xf0]  ;;  %v3834_v21 = vld [vmem:[#allocation5 + $0x7c4] sm:$0xf]  ;;  %v3048_v24 = vor.u32 %v3738_v11, %v3045_v12 }
  0x72   :  { %1781 = vmatpush.bf16.msra.mxu1 %v2584_v51  ;;  %1794 = vmatpush.bf16.msra.mxu2 %v2712_v52  ;;  %v3301_v17 = vld [vmem:[#allocation5 + $0x6d0] sm:$0xf0]  ;;  %v3176_v25 = vor.u32 %v3770_v13, %v3173_v15  ;;  %v3734_v27 = vld [vmem:[#allocation5 + $0x4a4] sm:$0xf] }
  0x73   :  { %1807 = vmatpush.bf16.msra.mxu3 %v2840_v56  ;;  %v3429_v23 = vld [vmem:[#allocation5 + $0x7d0] sm:$0xf0]  ;;  %v3304_v26 = vor.u32 %v3802_v16, %v3301_v17  ;;  %v3766_v29 = vld [vmem:[#allocation5 + $0x5a4] sm:$0xf] }
  0x74   :  { %1769 = vmatpush.bf16.msra.mxu0 %v2440_v63  ;;  %v3029_v28 = vld [vmem:[#allocation5 + $0x4b0] sm:$0xf0]  ;;  %v3432_v30 = vor.u32 %v3834_v21, %v3429_v23  ;;  %v3798_v32 = vld [vmem:[#allocation5 + $0x6a4] sm:$0xf] }
  0x75   :  { %v3157_v31 = vld [vmem:[#allocation5 + $0x5b0] sm:$0xf0]  ;;  %v3830_v34 = vld [vmem:[#allocation5 + $0x7a4] sm:$0xf]  ;;  %v3032_v36 = vor.u32 %v3734_v27, %v3029_v28 }
  0x76   :  { %1782 = vmatpush.bf16.msra.mxu1 %v2568_v3  ;;  %1795 = vmatpush.bf16.msra.mxu2 %v2696_v4  ;;  %v3285_v33 = vld [vmem:[#allocation5 + $0x6b0] sm:$0xf0]  ;;  %v3160_v37 = vor.u32 %v3766_v29, %v3157_v31  ;;  %v3730_v40 = vld [vmem:[#allocation5 + $0x484] sm:$0xf] }
  0x77   :  { %1808 = vmatpush.bf16.msra.mxu3 %v2824_v7  ;;  %v3413_v35 = vld [vmem:[#allocation5 + $0x7b0] sm:$0xf0]  ;;  %1770 = vmatmul.bf16.vlgmr.msra.gmra.mxu0 %v4069_v19  ;;  %v3288_v39 = vor.u32 %v3798_v32, %v3285_v33  ;;  %v3762_v45 = vld [vmem:[#allocation5 + $0x584] sm:$0xf] }
  0x78   :  { %1814 = vmatpush.bf16.msrb.mxu0 %v3064_v8  ;;  %v3013_v43 = vld [vmem:[#allocation5 + $0x490] sm:$0xf0]  ;;  %v3416_v46 = vor.u32 %v3830_v34, %v3413_v35  ;;  %v3794_v48 = vld [vmem:[#allocation5 + $0x684] sm:$0xf] }
  0x79   :  { %1796 = vmatmul.bf16.vlgmr.msra.gmra.mxu2 %v4067_v18  ;;  %1783 = vmatmul.bf16.vlgmr.msra.gmra.mxu1 %v4073_v22  ;;  %v3141_v47 = vld [vmem:[#allocation5 + $0x590] sm:$0xf0]  ;;  %v3826_v50 = vld [vmem:[#allocation5 + $0x784] sm:$0xf]  ;;  %v3016_v52 = vor.u32 %v3730_v40, %v3013_v43  ;;  %v2555_v43 = vld [vmem:[#allocation5 + $0xe8] sm:$0xf] }
  0x7a   :  { %1827 = vmatpush.bf16.msrb.mxu1 %v3192_v9  ;;  %1840 = vmatpush.bf16.msrb.mxu2 %v3320_v10  ;;  %v3269_v49 = vld [vmem:[#allocation5 + $0x690] sm:$0xf0]  ;;  %v3144_v53 = vor.u32 %v3762_v45, %v3141_v47  ;;  %v3726_v55 = vld [vmem:[#allocation5 + $0x464] sm:$0xf]  ;;  %v3617_v45 = vld [vmem:[#allocation5 + $0xf4] sm:$0xf0] }
  0x7b   :  { %1853 = vmatpush.bf16.msrb.mxu3 %v3448_v14  ;;  %v3397_v51 = vld [vmem:[#allocation5 + $0x790] sm:$0xf0]  ;;  %v3272_v54 = vor.u32 %v3794_v48, %v3269_v49  ;;  %v3758_v57 = vld [vmem:[#allocation5 + $0x564] sm:$0xf]  ;;  %v3649_v48 = vld [vmem:[#allocation5 + $0x1f4] sm:$0xf0] }
  0x7c   :  { %1809 = vmatmul.bf16.vlgmr.msra.gmra.mxu3 %v4071_v20  ;;  %1815 = vmatpush.bf16.msrb.mxu0 %v3048_v24  ;;  %v2997_v56 = vld [vmem:[#allocation5 + $0x470] sm:$0xf0]  ;;  %v3400_v58 = vor.u32 %v3826_v50, %v3397_v51  ;;  %v3790_v60 = vld [vmem:[#allocation5 + $0x664] sm:$0xf]  ;;  %v2811_v49 = vld [vmem:[#allocation5 + $0x2e8] sm:$0xf] }
  0x7d   :  { %v3125_v59 = vld [vmem:[#allocation5 + $0x570] sm:$0xf0]  ;;  %v3822_v62 = vld [vmem:[#allocation5 + $0x764] sm:$0xf]  ;;  %v3000_v0 = vor.u32 %v3726_v55, %v2997_v56  ;;  %v3681_v50 = vld [vmem:[#allocation5 + $0x2f4] sm:$0xf0]  ;;  %v2556_v56 = vor.u32 %v3617_v45, %v2555_v43 }
  0x7e   :  { %1828 = vmatpush.bf16.msrb.mxu1 %v3176_v25  ;;  %1841 = vmatpush.bf16.msrb.mxu2 %v3304_v26  ;;  %v3253_v61 = vld [vmem:[#allocation5 + $0x670] sm:$0xf0]  ;;  %v3128_v1 = vor.u32 %v3758_v57, %v3125_v59  ;;  %v3722_v3 = vld [vmem:[#allocation5 + $0x444] sm:$0xf]  ;;  %v2539_v59 = vld [vmem:[#allocation5 + $0xc8] sm:$0xf] }
  0x7f   :  { %1854 = vmatpush.bf16.msrb.mxu3 %v3432_v30  ;;  %v3381_v63 = vld [vmem:[#allocation5 + $0x770] sm:$0xf0]  ;;  %v3256_v2 = vor.u32 %v3790_v60, %v3253_v61  ;;  %v3754_v5 = vld [vmem:[#allocation5 + $0x544] sm:$0xf]  ;;  %v3613_v60 = vld [vmem:[#allocation5 + $0xd4] sm:$0xf0] }
  0x80   :  { %1816 = vmatpush.bf16.msrb.mxu0 %v3032_v36  ;;  %v2981_v4 = vld [vmem:[#allocation5 + $0x450] sm:$0xf0]  ;;  %v3384_v6 = vor.u32 %v3822_v62, %v3381_v63  ;;  %v3786_v8 = vld [vmem:[#allocation5 + $0x644] sm:$0xf]  ;;  %v2667_v61 = vld [vmem:[#allocation5 + $0x1c8] sm:$0xf] }
  0x81   :  { %v3109_v7 = vld [vmem:[#allocation5 + $0x550] sm:$0xf0]  ;;  %v3818_v10 = vld [vmem:[#allocation5 + $0x744] sm:$0xf]  ;;  %v2984_v12 = vor.u32 %v3722_v3, %v2981_v4  ;;  %v3645_v63 = vld [vmem:[#allocation5 + $0x1d4] sm:$0xf0]  ;;  %v2540_v4 = vor.u32 %v3613_v60, %v2539_v59 }
  0x82   :  { %1829 = vmatpush.bf16.msrb.mxu1 %v3160_v37  ;;  %1842 = vmatpush.bf16.msrb.mxu2 %v3288_v39  ;;  %v3237_v9 = vld [vmem:[#allocation5 + $0x650] sm:$0xf0]  ;;  %v3112_v13 = vor.u32 %v3754_v5, %v3109_v7  ;;  %v3718_v15 = vld [vmem:[#allocation5 + $0x424] sm:$0xf]  ;;  %v3709_v3 = vld [vmem:[#allocation5 + $0x3d4] sm:$0xf0]  ;;  %v2668_v5 = vor.u32 %v3645_v63, %v2667_v61 }
  0x83   :  { %1855 = vmatpush.bf16.msrb.mxu3 %v3416_v46  ;;  %v3365_v11 = vld [vmem:[#allocation5 + $0x750] sm:$0xf0]  ;;  %v3240_v14 = vor.u32 %v3786_v8, %v3237_v9  ;;  %v3750_v17 = vld [vmem:[#allocation5 + $0x524] sm:$0xf]  ;;  %v2683_v46 = vld [vmem:[#allocation5 + $0x1e8] sm:$0xf] }
  0x84   :  { %1817 = vmatpush.bf16.msrb.mxu0 %v3016_v52  ;;  %v2965_v16 = vld [vmem:[#allocation5 + $0x430] sm:$0xf0]  ;;  %v3368_v21 = vor.u32 %v3818_v10, %v3365_v11  ;;  %v3782_v24 = vld [vmem:[#allocation5 + $0x624] sm:$0xf]  ;;  %v2684_v57 = vor.u32 %v3649_v48, %v2683_v46  ;;  %v2523_v7 = vld [vmem:[#allocation5 + $0xa8] sm:$0xf] }
  0x85   :  { %v3093_v23 = vld [vmem:[#allocation5 + $0x530] sm:$0xf0]  ;;  %v3814_v26 = vld [vmem:[#allocation5 + $0x724] sm:$0xf]  ;;  %v2968_v28 = vor.u32 %v3718_v15, %v2965_v16  ;;  %v3609_v8 = vld [vmem:[#allocation5 + $0xb4] sm:$0xf0] }
  0x86   :  { %1830 = vmatpush.bf16.msrb.mxu1 %v3144_v53  ;;  %1843 = vmatpush.bf16.msrb.mxu2 %v3272_v54  ;;  %v3221_v25 = vld [vmem:[#allocation5 + $0x630] sm:$0xf0]  ;;  %v3714_v29 = vld [vmem:[#allocation5 + $0x404] sm:$0xf]  ;;  %v3096_v31 = vor.u32 %v3750_v17, %v3093_v23  ;;  %v2939_v53 = vld [vmem:[#allocation5 + $0x3e8] sm:$0xf]  ;;  %v2524_v16 = vor.u32 %v3609_v8, %v2523_v7 }
  0x87   :  { %1856 = vmatpush.bf16.msrb.mxu3 %v3400_v58  ;;  %v3349_v27 = vld [vmem:[#allocation5 + $0x730] sm:$0xf0]  ;;  %v3224_v32 = vor.u32 %v3782_v24, %v3221_v25  ;;  %v3746_v33 = vld [vmem:[#allocation5 + $0x504] sm:$0xf]  ;;  %v3713_v54 = vld [vmem:[#allocation5 + $0x3f4] sm:$0xf0]  ;;  %v2812_v58 = vor.u32 %v3681_v50, %v2811_v49 }
  0x88   :  { %1818 = vmatpush.bf16.msrb.mxu0 %v3000_v0  ;;  %v2949_v30 = vld [vmem:[#allocation5 + $0x410] sm:$0xf0]  ;;  %v3778_v35 = vld [vmem:[#allocation5 + $0x604] sm:$0xf]  ;;  %v3352_v36 = vor.u32 %v3814_v26, %v3349_v27  ;;  %v2940_v62 = vor.u32 %v3713_v54, %v2939_v53  ;;  %v2795_v0 = vld [vmem:[#allocation5 + $0x2c8] sm:$0xf] }
  0x89   :  { %v3077_v34 = vld [vmem:[#allocation5 + $0x510] sm:$0xf0]  ;;  %v3810_v39 = vld [vmem:[#allocation5 + $0x704] sm:$0xf]  ;;  %v2952_v47 = vor.u32 %v3714_v29, %v2949_v30  ;;  %v2651_v9 = vld [vmem:[#allocation5 + $0x1a8] sm:$0xf] }
  0x8a   :  { %1831 = vmatpush.bf16.msrb.mxu1 %v3128_v1  ;;  %1844 = vmatpush.bf16.msrb.mxu2 %v3256_v2  ;;  %v3205_v37 = vld [vmem:[#allocation5 + $0x610] sm:$0xf0]  ;;  %v3080_v51 = vor.u32 %v3746_v33, %v3077_v34  ;;  %v3677_v1 = vld [vmem:[#allocation5 + $0x2d4] sm:$0xf0]  ;;  %v2923_v2 = vld [vmem:[#allocation5 + $0x3c8] sm:$0xf] }
  0x8b   :  { %1857 = vmatpush.bf16.msrb.mxu3 %v3384_v6  ;;  %v3333_v40 = vld [vmem:[#allocation5 + $0x710] sm:$0xf0]  ;;  %v3208_v52 = vor.u32 %v3778_v35, %v3205_v37  ;;  %v2796_v6 = vor.u32 %v3677_v1, %v2795_v0  ;;  %v2924_v10 = vor.u32 %v3709_v3, %v2923_v2  ;;  %v3641_v11 = vld [vmem:[#allocation5 + $0x1b4] sm:$0xf0]  ;;  %v2507_v23 = vld [vmem:[#allocation5 + $0x88] sm:$0xf] }
  0x8c   :  { %1819 = vmatpush.bf16.msrb.mxu0 %v2984_v12  ;;  %v3336_v55 = vor.u32 %v3810_v39, %v3333_v40  ;;  %v2779_v12 = vld [vmem:[#allocation5 + $0x2a8] sm:$0xf]  ;;  %v3705_v15 = vld [vmem:[#allocation5 + $0x3b4] sm:$0xf0]  ;;  %v2652_v17 = vor.u32 %v3641_v11, %v2651_v9 }
  0x8d   :  { %v3605_v24 = vld [vmem:[#allocation5 + $0x94] sm:$0xf0]  ;;  %v2635_v25 = vld [vmem:[#allocation5 + $0x188] sm:$0xf] }
  0x8e   :  { %1832 = vmatpush.bf16.msrb.mxu1 %v3112_v13  ;;  %1845 = vmatpush.bf16.msrb.mxu2 %v3240_v14  ;;  %v3673_v13 = vld [vmem:[#allocation5 + $0x2b4] sm:$0xf0]  ;;  %v2907_v14 = vld [vmem:[#allocation5 + $0x3a8] sm:$0xf] }
  0x8f   :  { %1858 = vmatpush.bf16.msrb.mxu3 %v3368_v21  ;;  %v2780_v21 = vor.u32 %v3673_v13, %v2779_v12  ;;  %v2908_v26 = vor.u32 %v3705_v15, %v2907_v14  ;;  %v3637_v27 = vld [vmem:[#allocation5 + $0x194] sm:$0xf0]  ;;  %v2891_v30 = vld [vmem:[#allocation5 + $0x388] sm:$0xf] }
  0x90   :  { %1820 = vmatpush.bf16.msrb.mxu0 %v2968_v28  ;;  %v2763_v28 = vld [vmem:[#allocation5 + $0x288] sm:$0xf]  ;;  %v3669_v29 = vld [vmem:[#allocation5 + $0x294] sm:$0xf0]  ;;  %v2636_v33 = vor.u32 %v3637_v27, %v2635_v25 }
  0x91   :  { %v2764_v34 = vor.u32 %v3669_v29, %v2763_v28  ;;  %v2491_v35 = vld [vmem:[#allocation5 + $0x68] sm:$0xf]  ;;  %v3633_v40 = vld [vmem:[#allocation5 + $0x174] sm:$0xf0] }
  0x92   :  { %1833 = vmatpush.bf16.msrb.mxu1 %v3096_v31  ;;  %1846 = vmatpush.bf16.msrb.mxu2 %v3224_v32  ;;  %v3701_v31 = vld [vmem:[#allocation5 + $0x394] sm:$0xf0]  ;;  %v2508_v32 = vor.u32 %v3605_v24, %v2507_v23  ;;  %v2619_v37 = vld [vmem:[#allocation5 + $0x168] sm:$0xf] }
  0x93   :  { %1859 = vmatpush.bf16.msrb.mxu3 %v3352_v36  ;;  %v3601_v36 = vld [vmem:[#allocation5 + $0x74] sm:$0xf0]  ;;  %v2892_v39 = vor.u32 %v3701_v31, %v2891_v30  ;;  %v2747_v43 = vld [vmem:[#allocation5 + $0x268] sm:$0xf]  ;;  %v2620_v49 = vor.u32 %v3633_v40, %v2619_v37 }
  0x94   :  { %1821 = vmatpush.bf16.msrb.mxu0 %v2952_v47  ;;  %v3665_v45 = vld [vmem:[#allocation5 + $0x274] sm:$0xf0]  ;;  %v2875_v46 = vld [vmem:[#allocation5 + $0x368] sm:$0xf]  ;;  %v2492_v48 = vor.u32 %v3601_v36, %v2491_v35 }
  0x95   :  { %v3697_v47 = vld [vmem:[#allocation5 + $0x374] sm:$0xf0]  ;;  %v2748_v50 = vor.u32 %v3665_v45, %v2747_v43  ;;  %v2603_v53 = vld [vmem:[#allocation5 + $0x148] sm:$0xf] }
  0x96   :  { %1834 = vmatpush.bf16.msrb.mxu1 %v3080_v51  ;;  %1847 = vmatpush.bf16.msrb.mxu2 %v3208_v52  ;;  %v2475_v51 = vld [vmem:[#allocation5 + $0x48] sm:$0xf]  ;;  %v3597_v52 = vld [vmem:[#allocation5 + $0x54] sm:$0xf0]  ;;  %v2876_v54 = vor.u32 %v3697_v47, %v2875_v46 }
  0x97   :  { %1860 = vmatpush.bf16.msrb.mxu3 %v3336_v55  ;;  %1822 = vmatmul.bf16.vlgmr.msrb.gmra.mxu0 %v4081_v41  ;;  %v3629_v55 = vld [vmem:[#allocation5 + $0x154] sm:$0xf0]  ;;  %v2476_v60 = vor.u32 %v3597_v52, %v2475_v51  ;;  %v2459_v63 = vld [vmem:[#allocation5 + $0x28] sm:$0xf] }
  0x98   :  { %1866 = vmatpush.bf16.msra.mxu0 %v2556_v56  ;;  %v2731_v56 = vld [vmem:[#allocation5 + $0x248] sm:$0xf]  ;;  %v3693_v59 = vld [vmem:[#allocation5 + $0x354] sm:$0xf0]  ;;  %v2604_v61 = vor.u32 %v3629_v55, %v2603_v53 }
  0x99   :  { %1848 = vmatmul.bf16.vlgmr.msrb.gmra.mxu2 %v4079_v38  ;;  %1835 = vmatmul.bf16.vlgmr.msrb.gmra.mxu1 %v4085_v44  ;;  %v3593_v0 = vld [vmem:[#allocation5 + $0x34] sm:$0xf0]  ;;  %v2587_v1 = vld [vmem:[#allocation5 + $0x128] sm:$0xf] }
  0x9a   :  { %1879 = vmatpush.bf16.msra.mxu1 %v2684_v57  ;;  %1892 = vmatpush.bf16.msra.mxu2 %v2812_v58  ;;  %v3661_v57 = vld [vmem:[#allocation5 + $0x254] sm:$0xf0]  ;;  %v2859_v58 = vld [vmem:[#allocation5 + $0x348] sm:$0xf]  ;;  %v2460_v8 = vor.u32 %v3593_v0, %v2459_v63 }
  0x9b   :  { %1905 = vmatpush.bf16.msra.mxu3 %v2940_v62  ;;  %v2732_v62 = vor.u32 %v3661_v57, %v2731_v56  ;;  %v2860_v2 = vor.u32 %v3693_v59, %v2859_v58  ;;  %v3625_v3 = vld [vmem:[#allocation5 + $0x134] sm:$0xf0]  ;;  %v2443_v9 = vld [vmem:[#allocation5 + $0x8] sm:$0xf] }
  0x9c   :  { %1861 = vmatmul.bf16.vlgmr.msrb.gmra.mxu3 %v4083_v42  ;;  %1867 = vmatpush.bf16.msra.mxu0 %v2540_v4  ;;  %v2715_v4 = vld [vmem:[#allocation5 + $0x228] sm:$0xf]  ;;  %v3689_v7 = vld [vmem:[#allocation5 + $0x334] sm:$0xf0]  ;;  %v2588_v11 = vor.u32 %v3625_v3, %v2587_v1 }
  0x9d   :  { %v2571_v13 = vld [vmem:[#allocation5 + $0x108] sm:$0xf]  ;;  %v3621_v14 = vld [vmem:[#allocation5 + $0x114] sm:$0xf0] }
  0x9e   :  { %1880 = vmatpush.bf16.msra.mxu1 %v2668_v5  ;;  %1893 = vmatpush.bf16.msra.mxu2 %v2796_v6  ;;  %v3657_v5 = vld [vmem:[#allocation5 + $0x234] sm:$0xf0]  ;;  %v2843_v6 = vld [vmem:[#allocation5 + $0x328] sm:$0xf]  ;;  %v2572_v31 = vor.u32 %v3621_v14, %v2571_v13 }
  0x9f   :  { %1906 = vmatpush.bf16.msra.mxu3 %v2924_v10  ;;  %v3589_v10 = vld [vmem:[#allocation5 + $0x14] sm:$0xf0]  ;;  %v2716_v12 = vor.u32 %v3657_v5, %v2715_v4  ;;  %v2699_v15 = vld [vmem:[#allocation5 + $0x208] sm:$0xf] }
  0xa0   :  { %1868 = vmatpush.bf16.msra.mxu0 %v2524_v16  ;;  %v2844_v16 = vor.u32 %v3689_v7, %v2843_v6  ;;  %v3685_v23 = vld [vmem:[#allocation5 + $0x314] sm:$0xf0]  ;;  %v3067_v24 = vld [vmem:[#allocation5 + $0x4e8] sm:$0xf]  ;;  %v2444_v27 = vor.u32 %v3589_v10, %v2443_v9 }
  0xa1   :  { %v3745_v25 = vld [vmem:[#allocation5 + $0x4f4] sm:$0xf0]  ;;  %v3323_v29 = vld [vmem:[#allocation5 + $0x6e8] sm:$0xf] }
  0xa2   :  { %1881 = vmatpush.bf16.msra.mxu1 %v2652_v17  ;;  %1894 = vmatpush.bf16.msra.mxu2 %v2780_v21  ;;  %v3653_v17 = vld [vmem:[#allocation5 + $0x214] sm:$0xf0]  ;;  %v2827_v21 = vld [vmem:[#allocation5 + $0x308] sm:$0xf]  ;;  %v3068_v36 = vor.u32 %v3745_v25, %v3067_v24 }
  0xa3   :  { %1907 = vmatpush.bf16.msra.mxu3 %v2908_v26  ;;  %v3195_v26 = vld [vmem:[#allocation5 + $0x5e8] sm:$0xf]  ;;  %v3777_v28 = vld [vmem:[#allocation5 + $0x5f4] sm:$0xf0]  ;;  %v2828_v35 = vor.u32 %v3685_v23, %v2827_v21 }
  0xa4   :  { %1869 = vmatpush.bf16.msra.mxu0 %v2508_v32  ;;  %v3809_v30 = vld [vmem:[#allocation5 + $0x6f4] sm:$0xf0]  ;;  %v2700_v32 = vor.u32 %v3653_v17, %v2699_v15  ;;  %v3196_v37 = vor.u32 %v3777_v28, %v3195_v26  ;;  %v3051_v40 = vld [vmem:[#allocation5 + $0x4c8] sm:$0xf]  ;;  %v4103_v26 = vld [vmem:[#allocation7] sm:$0xf] }
  0xa5   :  { %v3741_v43 = vld [vmem:[#allocation5 + $0x4d4] sm:$0xf0]  ;;  %v3179_v45 = vld [vmem:[#allocation5 + $0x5c8] sm:$0xf] }
  0xa6   :  { %1882 = vmatpush.bf16.msra.mxu1 %v2636_v33  ;;  %1895 = vmatpush.bf16.msra.mxu2 %v2764_v34  ;;  %v3451_v33 = vld [vmem:[#allocation5 + $0x7e8] sm:$0xf]  ;;  %v3841_v34 = vld [vmem:[#allocation5 + $0x7f4] sm:$0xf0]  ;;  %v3052_v52 = vor.u32 %v3741_v43, %v3051_v40 }
  0xa7   :  { %1908 = vmatpush.bf16.msra.mxu3 %v2892_v39  ;;  %v3324_v39 = vor.u32 %v3809_v30, %v3323_v29  ;;  %v3452_v46 = vor.u32 %v3841_v34, %v3451_v33  ;;  %v3773_v47 = vld [vmem:[#allocation5 + $0x5d4] sm:$0xf0]  ;;  %v3035_v55 = vld [vmem:[#allocation5 + $0x4a8] sm:$0xf] }
  0xa8   :  { %1870 = vmatpush.bf16.msra.mxu0 %v2492_v48  ;;  %v3307_v48 = vld [vmem:[#allocation5 + $0x6c8] sm:$0xf]  ;;  %v3837_v51 = vld [vmem:[#allocation5 + $0x7d4] sm:$0xf0]  ;;  %v3180_v53 = vor.u32 %v3773_v47, %v3179_v45 }
  0xa9   :  { %v3737_v56 = vld [vmem:[#allocation5 + $0x4b4] sm:$0xf0]  ;;  %v3163_v57 = vld [vmem:[#allocation5 + $0x5a8] sm:$0xf] }
  0xaa   :  { %1883 = vmatpush.bf16.msra.mxu1 %v2620_v49  ;;  %1896 = vmatpush.bf16.msra.mxu2 %v2748_v50  ;;  %v3805_v49 = vld [vmem:[#allocation5 + $0x6d4] sm:$0xf0]  ;;  %v3435_v50 = vld [vmem:[#allocation5 + $0x7c8] sm:$0xf]  ;;  %v3036_v0 = vor.u32 %v3737_v56, %v3035_v55 }
  0xab   :  { %1909 = vmatpush.bf16.msra.mxu3 %v2876_v54  ;;  %v3308_v54 = vor.u32 %v3805_v49, %v3307_v48  ;;  %v3436_v58 = vor.u32 %v3837_v51, %v3435_v50  ;;  %v3769_v59 = vld [vmem:[#allocation5 + $0x5b4] sm:$0xf0]  ;;  %v3019_v3 = vld [vmem:[#allocation5 + $0x488] sm:$0xf] }
  0xac   :  { %1871 = vmatpush.bf16.msra.mxu0 %v2476_v60  ;;  %v3291_v60 = vld [vmem:[#allocation5 + $0x6a8] sm:$0xf]  ;;  %v3833_v63 = vld [vmem:[#allocation5 + $0x7b4] sm:$0xf0]  ;;  %v3164_v1 = vor.u32 %v3769_v59, %v3163_v57 }
  0xad   :  { %v3733_v4 = vld [vmem:[#allocation5 + $0x494] sm:$0xf0]  ;;  %v3147_v5 = vld [vmem:[#allocation5 + $0x588] sm:$0xf] }
  0xae   :  { %1884 = vmatpush.bf16.msra.mxu1 %v2604_v61  ;;  %1897 = vmatpush.bf16.msra.mxu2 %v2732_v62  ;;  %v3801_v61 = vld [vmem:[#allocation5 + $0x6b4] sm:$0xf0]  ;;  %v3419_v62 = vld [vmem:[#allocation5 + $0x7a8] sm:$0xf] }
  0xaf   :  { %1910 = vmatpush.bf16.msra.mxu3 %v2860_v2  ;;  %v3292_v2 = vor.u32 %v3801_v61, %v3291_v60  ;;  %v3420_v6 = vor.u32 %v3833_v63, %v3419_v62  ;;  %v3765_v7 = vld [vmem:[#allocation5 + $0x594] sm:$0xf0]  ;;  %v3403_v10 = vld [vmem:[#allocation5 + $0x788] sm:$0xf] }
  0xb0   :  { %1872 = vmatpush.bf16.msra.mxu0 %v2460_v8  ;;  %v3275_v8 = vld [vmem:[#allocation5 + $0x688] sm:$0xf]  ;;  %v3797_v9 = vld [vmem:[#allocation5 + $0x694] sm:$0xf0]  ;;  %v3148_v14 = vor.u32 %v3765_v7, %v3147_v5 }
  0xb1   :  { %v3003_v13 = vld [vmem:[#allocation5 + $0x468] sm:$0xf]  ;;  %v3276_v15 = vor.u32 %v3797_v9, %v3275_v8  ;;  %v3761_v21 = vld [vmem:[#allocation5 + $0x574] sm:$0xf0] }
  0xb2   :  { %1885 = vmatpush.bf16.msra.mxu1 %v2588_v11  ;;  %1898 = vmatpush.bf16.msra.mxu2 %v2716_v12  ;;  %v3829_v11 = vld [vmem:[#allocation5 + $0x794] sm:$0xf0]  ;;  %v3020_v12 = vor.u32 %v3733_v4, %v3019_v3  ;;  %v3131_v17 = vld [vmem:[#allocation5 + $0x568] sm:$0xf] }
  0xb3   :  { %1911 = vmatpush.bf16.msra.mxu3 %v2844_v16  ;;  %v3729_v16 = vld [vmem:[#allocation5 + $0x474] sm:$0xf0]  ;;  %v3404_v23 = vor.u32 %v3829_v11, %v3403_v10  ;;  %v3259_v24 = vld [vmem:[#allocation5 + $0x668] sm:$0xf] }
  0xb4   :  { %1873 = vmatpush.bf16.msra.mxu0 %v2444_v27  ;;  %v3793_v25 = vld [vmem:[#allocation5 + $0x674] sm:$0xf0]  ;;  %v3387_v27 = vld [vmem:[#allocation5 + $0x768] sm:$0xf]  ;;  %v3004_v29 = vor.u32 %v3729_v16, %v3003_v13  ;;  %v3615_v13 = vld [vmem:[#allocation5 + $0xec] sm:$0xf] }
  0xb5   :  { %v3825_v28 = vld [vmem:[#allocation5 + $0x774] sm:$0xf0]  ;;  %v2987_v30 = vld [vmem:[#allocation5 + $0x448] sm:$0xf] }
  0xb6   :  { %1886 = vmatpush.bf16.msra.mxu1 %v2572_v31  ;;  %1899 = vmatpush.bf16.msra.mxu2 %v2700_v32  ;;  %v3132_v31 = vor.u32 %v3761_v21, %v3131_v17  ;;  %v3260_v32 = vor.u32 %v3793_v25, %v3259_v24  ;;  %v3725_v33 = vld [vmem:[#allocation5 + $0x454] sm:$0xf0]  ;;  %v3115_v34 = vld [vmem:[#allocation5 + $0x548] sm:$0xf]  ;;  %v2685_v17 = vld [vmem:[#allocation5 + $0x1f8] sm:$0xf0] }
  0xb7   :  { %1912 = vmatpush.bf16.msra.mxu3 %v2828_v35  ;;  %1874 = vmatmul.bf16.vlgmr.msra.gmra.mxu0 %v4069_v19  ;;  %v342_v35 = vperm.slane %v4103_v26, 0  ;;  %v3789_v40 = vld [vmem:[#allocation5 + $0x654] sm:$0xf0]  ;;  %v3371_v43 = vld [vmem:[#allocation5 + $0x748] sm:$0xf] }
  0xb8   :  { %1918 = vmatpush.bf16.msrb.mxu0 %v3068_v36  ;;  %v3388_v36 = vor.u32 %v3825_v28, %v3387_v27  ;;  %v3821_v45 = vld [vmem:[#allocation5 + $0x754] sm:$0xf0]  ;;  %v2971_v50 = vld [vmem:[#allocation5 + $0x428] sm:$0xf]  ;;  %v3679_v21 = vld [vmem:[#allocation5 + $0x2ec] sm:$0xf] }
  0xb9   :  { %1900 = vmatmul.bf16.vlgmr.msra.gmra.mxu2 %v4067_v18  ;;  %1887 = vmatmul.bf16.vlgmr.msra.gmra.mxu1 %v4073_v22  ;;  %v3721_v51 = vld [vmem:[#allocation5 + $0x434] sm:$0xf0]  ;;  %v3372_v55 = vor.u32 %v3821_v45, %v3371_v43  ;;  %v3227_v57 = vld [vmem:[#allocation5 + $0x628] sm:$0xf]  ;;  %v2669_v43 = vld [vmem:[#allocation5 + $0x1d8] sm:$0xf0] }
  0xba   :  { %1931 = vmatpush.bf16.msrb.mxu1 %v3196_v37  ;;  %1944 = vmatpush.bf16.msrb.mxu2 %v3324_v39  ;;  %v3757_v37 = vld [vmem:[#allocation5 + $0x554] sm:$0xf0]  ;;  %v3243_v39 = vld [vmem:[#allocation5 + $0x648] sm:$0xf]  ;;  %v2972_v62 = vor.u32 %v3721_v51, %v2971_v50  ;;  %v3675_v45 = vld [vmem:[#allocation5 + $0x2cc] sm:$0xf] }
  0xbb   :  { %1957 = vmatpush.bf16.msrb.mxu3 %v3452_v46  ;;  %v2988_v46 = vor.u32 %v3725_v33, %v2987_v30  ;;  %v3116_v48 = vor.u32 %v3757_v37, %v3115_v34  ;;  %v3244_v49 = vor.u32 %v3789_v40, %v3243_v39  ;;  %v3753_v56 = vld [vmem:[#allocation5 + $0x534] sm:$0xf0]  ;;  %v3355_v59 = vld [vmem:[#allocation5 + $0x728] sm:$0xf]  ;;  %v2941_v30 = vld [vmem:[#allocation5 + $0x3f8] sm:$0xf0] }
  0xbc   :  { %1913 = vmatmul.bf16.vlgmr.msra.gmra.mxu3 %v4071_v20  ;;  %1919 = vmatpush.bf16.msrb.mxu0 %v3052_v52  ;;  %v3099_v52 = vld [vmem:[#allocation5 + $0x528] sm:$0xf]  ;;  %v3817_v60 = vld [vmem:[#allocation5 + $0x734] sm:$0xf0]  ;;  %v2541_v37 = vld [vmem:[#allocation5 + $0xd8] sm:$0xf0] }
  0xbd   :  { %v2955_v63 = vld [vmem:[#allocation5 + $0x408] sm:$0xf]  ;;  %v3749_v4 = vld [vmem:[#allocation5 + $0x514] sm:$0xf0]  ;;  %v3356_v7 = vor.u32 %v3817_v60, %v3355_v59  ;;  %v3643_v39 = vld [vmem:[#allocation5 + $0x1cc] sm:$0xf] }
  0xbe   :  { %1932 = vmatpush.bf16.msrb.mxu1 %v3180_v53  ;;  %1945 = vmatpush.bf16.msrb.mxu2 %v3308_v54  ;;  %v3083_v3 = vld [vmem:[#allocation5 + $0x508] sm:$0xf]  ;;  %v3781_v8 = vld [vmem:[#allocation5 + $0x614] sm:$0xf0]  ;;  %v3671_v59 = vld [vmem:[#allocation5 + $0x2ac] sm:$0xf] }
  0xbf   :  { %1958 = vmatpush.bf16.msrb.mxu3 %v3436_v58  ;;  %v3785_v58 = vld [vmem:[#allocation5 + $0x634] sm:$0xf0]  ;;  %v3211_v5 = vld [vmem:[#allocation5 + $0x608] sm:$0xf]  ;;  %v3084_v27 = vor.u32 %v3749_v4, %v3083_v3  ;;  %v2781_v60 = vld [vmem:[#allocation5 + $0x2b8] sm:$0xf0] }
  0xc0   :  { %1920 = vmatpush.bf16.msrb.mxu0 %v3036_v0  ;;  %v3717_v0 = vld [vmem:[#allocation5 + $0x414] sm:$0xf0]  ;;  %v3339_v9 = vld [vmem:[#allocation5 + $0x708] sm:$0xf]  ;;  %v3212_v28 = vor.u32 %v3781_v8, %v3211_v5  ;;  %v2509_v3 = vld [vmem:[#allocation5 + $0x98] sm:$0xf0] }
  0xc1   :  { %v3813_v10 = vld [vmem:[#allocation5 + $0x714] sm:$0xf0]  ;;  %v2956_v16 = vor.u32 %v3717_v0, %v2955_v63  ;;  %v3635_v4 = vld [vmem:[#allocation5 + $0x18c] sm:$0xf]  ;;  %v2765_v8 = vld [vmem:[#allocation5 + $0x298] sm:$0xf0] }
  0xc2   :  { %1933 = vmatpush.bf16.msrb.mxu1 %v3164_v1  ;;  %1946 = vmatpush.bf16.msrb.mxu2 %v3292_v2  ;;  %v1667_v47 = vpop.f32.mrf.mxu0  ;;  %v1680_v54 = vpop.f32.mrf.mxu1  ;;  %v3100_v1 = vor.u32 %v3753_v56, %v3099_v52  ;;  %v3228_v2 = vor.u32 %v3785_v58, %v3227_v57  ;;  %v2672_v52 = vor.u32 %v3643_v39, %v2669_v43  ;;  %v3639_v56 = vld [vmem:[#allocation5 + $0x1ac] sm:$0xf]  ;;  %v2653_v58 = vld [vmem:[#allocation5 + $0x1b8] sm:$0xf0] }
  0xc3   :  { %1959 = vmatpush.bf16.msrb.mxu3 %v3420_v6  ;;  %v1668_v53 = vadd.f32 %v1667_v47, %v342_v35  ;;  %v1693_v6 = vpop.f32.mrf.mxu2  ;;  %v3707_v47 = vld [vmem:[#allocation5 + $0x3cc] sm:$0xf]  ;;  %v2656_v0 = vor.u32 %v3639_v56, %v2653_v58  ;;  %v2605_v43 = vld [vmem:[#allocation5 + $0x158] sm:$0xf0] }
  0xc4   :  { %1921 = vmatpush.bf16.msrb.mxu0 %v3020_v12  ;;  %v1706_v12 = vpop.f32.mrf.mxu3  ;;  %v3627_v39 = vld [vmem:[#allocation5 + $0x14c] sm:$0xf] }
  0xc5   :  { %v1681_v61 = vadd.f32 %v1680_v54, %v1668_v53  ;;  %v3607_v54 = vld [vmem:[#allocation5 + $0xac] sm:$0xf] }
  0xc6   :  { %1934 = vmatpush.bf16.msrb.mxu1 %v3148_v14  ;;  %1947 = vmatpush.bf16.msrb.mxu2 %v3276_v15  ;;  %v2557_v14 = vld [vmem:[#allocation5 + $0xf8] sm:$0xf0]  ;;  %v3647_v15 = vld [vmem:[#allocation5 + $0x1ec] sm:$0xf] }
  0xc7   :  { %1960 = vmatpush.bf16.msrb.mxu3 %v3404_v23  ;;  %v1694_v11 = vadd.f32 %v1693_v6, %v1681_v61  ;;  %v2813_v23 = vld [vmem:[#allocation5 + $0x2f8] sm:$0xf0]  ;;  %v2560_v33 = vor.u32 %v3615_v13, %v2557_v14  ;;  %v2688_v34 = vor.u32 %v3647_v15, %v2685_v17  ;;  %v3703_v61 = vld [vmem:[#allocation5 + $0x3ac] sm:$0xf] }
  0xc8   :  { %1922 = vmatpush.bf16.msrb.mxu0 %v3004_v29  ;;  %v3711_v29 = vld [vmem:[#allocation5 + $0x3ec] sm:$0xf]  ;;  %v2816_v35 = vor.u32 %v3679_v21, %v2813_v23  ;;  %v2637_v6 = vld [vmem:[#allocation5 + $0x198] sm:$0xf0] }
  0xc9   :  { %v4106_v24 = vadd.f32 %v1706_v12, %v1694_v11  ;;  %v2944_v40 = vor.u32 %v3711_v29, %v2941_v30  ;;  %v2640_v13 = vor.u32 %v3635_v4, %v2637_v6  ;;  %v3599_v15 = vld [vmem:[#allocation5 + $0x6c] sm:$0xf]  ;;  %v2749_v29 = vld [vmem:[#allocation5 + $0x278] sm:$0xf0] }
  0xca   :  { %1935 = vmatpush.bf16.msrb.mxu1 %v3132_v31  ;;  %1948 = vmatpush.bf16.msrb.mxu2 %v3260_v32  ;;  %v1669_v25 = vpop.f32.mrf.mxu0  ;;  %v1682_v31 = vpop.f32.mrf.mxu1  ;;  %v3340_v32 = vor.u32 %v3813_v10, %v3339_v9  ;;  %v3699_v9 = vld [vmem:[#allocation5 + $0x38c] sm:$0xf]  ;;  %v2893_v10 = vld [vmem:[#allocation5 + $0x398] sm:$0xf0] }
  0xcb   :  { %1961 = vmatpush.bf16.msrb.mxu3 %v3388_v36  ;;  %v3611_v36 = vld [vmem:[#allocation5 + $0xcc] sm:$0xf]  ;;  %v2896_v25 = vor.u32 %v3699_v9, %v2893_v10  ;;  %v2877_v31 = vld [vmem:[#allocation5 + $0x378] sm:$0xf0] }
  0xcc   :  { %1923 = vmatpush.bf16.msrb.mxu0 %v2988_v46  ;;  %v2797_v46 = vld [vmem:[#allocation5 + $0x2d8] sm:$0xf0]  ;;  %v2544_v50 = vor.u32 %v3611_v36, %v2541_v37  ;;  %v1708_v51 = vpop.f32.mrf.mxu3  ;;  %v3631_v17 = vld [vmem:[#allocation5 + $0x16c] sm:$0xf] }
  0xcd   :  { %v2800_v53 = vor.u32 %v3675_v45, %v2797_v46  ;;  %v3695_v30 = vld [vmem:[#allocation5 + $0x36c] sm:$0xf]  ;;  %v2477_v37 = vld [vmem:[#allocation5 + $0x58] sm:$0xf0] }
  0xce   :  { %1936 = vmatpush.bf16.msrb.mxu1 %v3116_v48  ;;  %1949 = vmatpush.bf16.msrb.mxu2 %v3244_v49  ;;  %v2925_v48 = vld [vmem:[#allocation5 + $0x3d8] sm:$0xf0]  ;;  %v1695_v49 = vpop.f32.mrf.mxu2  ;;  %v3595_v36 = vld [vmem:[#allocation5 + $0x4c] sm:$0xf] }
  0xcf   :  { %1962 = vmatpush.bf16.msrb.mxu3 %v3372_v55  ;;  %v2525_v55 = vld [vmem:[#allocation5 + $0xb8] sm:$0xf0]  ;;  %v2928_v57 = vor.u32 %v3707_v47, %v2925_v48  ;;  %v3659_v45 = vld [vmem:[#allocation5 + $0x24c] sm:$0xf]  ;;  %v2480_v51 = vor.u32 %v3595_v36, %v2477_v37 }
  0xd0   :  { %1924 = vmatpush.bf16.msrb.mxu0 %v2972_v62  ;;  %v2909_v62 = vld [vmem:[#allocation5 + $0x3b8] sm:$0xf0]  ;;  %v2528_v63 = vor.u32 %v3607_v54, %v2525_v55  ;;  %v3691_v49 = vld [vmem:[#allocation5 + $0x34c] sm:$0xf]  ;;  %v2608_v54 = vor.u32 %v3627_v39, %v2605_v43 }
  0xd1   :  { %v2912_v5 = vor.u32 %v3703_v61, %v2909_v62  ;;  %v2733_v46 = vld [vmem:[#allocation5 + $0x258] sm:$0xf0]  ;;  %v3591_v56 = vld [vmem:[#allocation5 + $0x2c] sm:$0xf] }
  0xd2   :  { %1937 = vmatpush.bf16.msrb.mxu1 %v3100_v1  ;;  %1950 = vmatpush.bf16.msrb.mxu2 %v3228_v2  ;;  %v2784_v1 = vor.u32 %v3671_v59, %v2781_v60  ;;  %v3603_v2 = vld [vmem:[#allocation5 + $0x8c] sm:$0xf]  ;;  %v2736_v55 = vor.u32 %v3659_v45, %v2733_v46  ;;  %v2589_v61 = vld [vmem:[#allocation5 + $0x138] sm:$0xf0] }
  0xd3   :  { %1963 = vmatpush.bf16.msrb.mxu3 %v3356_v7  ;;  %v3667_v7 = vld [vmem:[#allocation5 + $0x28c] sm:$0xf]  ;;  %v2512_v11 = vor.u32 %v3603_v2, %v2509_v3  ;;  %v2445_v4 = vld [vmem:[#allocation5 + $0x18] sm:$0xf0] }
  0xd4   :  { %1925 = vmatpush.bf16.msrb.mxu0 %v2956_v16  ;;  %v2768_v14 = vor.u32 %v3667_v7, %v2765_v8  ;;  %v2493_v16 = vld [vmem:[#allocation5 + $0x78] sm:$0xf0]  ;;  %v3623_v58 = vld [vmem:[#allocation5 + $0x12c] sm:$0xf] }
  0xd5   :  { %v3655_v62 = vld [vmem:[#allocation5 + $0x22c] sm:$0xf]  ;;  %v2573_v8 = vld [vmem:[#allocation5 + $0x118] sm:$0xf0] }
  0xd6   :  { %1938 = vmatpush.bf16.msrb.mxu1 %v3084_v27  ;;  %1951 = vmatpush.bf16.msrb.mxu2 %v3212_v28  ;;  %v1719_v12 = vpop.f32.mrf.mxu0  ;;  %v2621_v27 = vld [vmem:[#allocation5 + $0x178] sm:$0xf0]  ;;  %v3663_v28 = vld [vmem:[#allocation5 + $0x26c] sm:$0xf] }
  0xd7   :  { %1964 = vmatpush.bf16.msrb.mxu3 %v3340_v32  ;;  %1926 = vmatmul.bf16.vlgmr.msrb.gmra.mxu0 %v4081_v41  ;;  %v1720_v21 = vadd.f32 %v1719_v12, %v4106_v24  ;;  %v2880_v24 = vor.u32 %v3695_v30, %v2877_v31  ;;  %v3587_v3 = vld [vmem:[#allocation5 + $0xc] sm:$0xf]  ;;  %v2701_v12 = vld [vmem:[#allocation5 + $0x218] sm:$0xf0] }
  0xd8   :  { %1970 = vmatpush.bf16.msra.mxu0 %v2560_v33  ;;  %v1732_v23 = vpop.f32.mrf.mxu1  ;;  %v2496_v33 = vor.u32 %v3599_v15, %v2493_v16  ;;  %v3619_v7 = vld [vmem:[#allocation5 + $0x10c] sm:$0xf]  ;;  %v3053_v39 = vld [vmem:[#allocation5 + $0x4d8] sm:$0xf0] }
  0xd9   :  { %1952 = vmatmul.bf16.vlgmr.msrb.gmra.mxu2 %v4079_v38  ;;  %1939 = vmatmul.bf16.vlgmr.msrb.gmra.mxu1 %v4085_v44  ;;  %v1733_v32 = vadd.f32 %v1732_v23, %v1720_v21  ;;  %v3651_v9 = vld [vmem:[#allocation5 + $0x20c] sm:$0xf]  ;;  %v2448_v23 = vor.u32 %v3587_v3, %v2445_v4  ;;  %v3181_v43 = vld [vmem:[#allocation5 + $0x5d8] sm:$0xf0] }
  0xda   :  { %1983 = vmatpush.bf16.msra.mxu1 %v2688_v34  ;;  %1996 = vmatpush.bf16.msra.mxu2 %v2816_v35  ;;  %v2624_v34 = vor.u32 %v3631_v17, %v2621_v27  ;;  %v2752_v35 = vor.u32 %v3663_v28, %v2749_v29  ;;  %v3743_v16 = vld [vmem:[#allocation5 + $0x4ec] sm:$0xf]  ;;  %v3069_v17 = vld [vmem:[#allocation5 + $0x4f8] sm:$0xf0]  ;;  %v2576_v29 = vor.u32 %v3619_v7, %v2573_v8 }
  0xdb   :  { %2009 = vmatpush.bf16.msra.mxu3 %v2944_v40  ;;  %v3775_v21 = vld [vmem:[#allocation5 + $0x5ec] sm:$0xf]  ;;  %v3325_v28 = vld [vmem:[#allocation5 + $0x6f8] sm:$0xf0]  ;;  %v2704_v30 = vor.u32 %v3651_v9, %v2701_v12 }
  0xdc   :  { %1965 = vmatmul.bf16.vlgmr.msrb.gmra.mxu3 %v4083_v42  ;;  %1971 = vmatpush.bf16.msra.mxu0 %v2544_v50  ;;  %v1745_v40 = vpop.f32.mrf.mxu2  ;;  %v2861_v50 = vld [vmem:[#allocation5 + $0x358] sm:$0xf0]  ;;  %v3807_v27 = vld [vmem:[#allocation5 + $0x6ec] sm:$0xf] }
  0xdd   :  { %v1746_v47 = vadd.f32 %v1745_v40, %v1733_v32  ;;  %v2864_v60 = vor.u32 %v3691_v49, %v2861_v50  ;;  %v3839_v31 = vld [vmem:[#allocation5 + $0x7ec] sm:$0xf]  ;;  %v3453_v32 = vld [vmem:[#allocation5 + $0x7f8] sm:$0xf0]  ;;  %v3328_v36 = vor.u32 %v3807_v27, %v3325_v28 }
  0xde   :  { %1984 = vmatpush.bf16.msra.mxu1 %v2672_v52  ;;  %1997 = vmatpush.bf16.msra.mxu2 %v2800_v53  ;;  %v1721_v53 = vpop.f32.mrf.mxu0  ;;  %v3739_v37 = vld [vmem:[#allocation5 + $0x4cc] sm:$0xf]  ;;  %v3309_v46 = vld [vmem:[#allocation5 + $0x6d8] sm:$0xf0] }
  0xdf   :  { %2010 = vmatpush.bf16.msra.mxu3 %v2928_v57  ;;  %v1758_v48 = vpop.f32.mrf.mxu3  ;;  %v2461_v57 = vld [vmem:[#allocation5 + $0x38] sm:$0xf0]  ;;  %v3771_v40 = vld [vmem:[#allocation5 + $0x5cc] sm:$0xf]  ;;  %v3056_v49 = vor.u32 %v3739_v37, %v3053_v39 }
  0xe0   :  { %1972 = vmatpush.bf16.msra.mxu0 %v2528_v63  ;;  %v4113_v52 = vadd.f32 %v1758_v48, %v1746_v47  ;;  %v1734_v59 = vpop.f32.mrf.mxu1  ;;  %v2717_v63 = vld [vmem:[#allocation5 + $0x238] sm:$0xf0]  ;;  %v2464_v2 = vor.u32 %v3591_v56, %v2461_v57  ;;  %v3803_v45 = vld [vmem:[#allocation5 + $0x6cc] sm:$0xf]  ;;  %v3184_v50 = vor.u32 %v3771_v40, %v3181_v43 }
  0xe1   :  { %v2720_v6 = vor.u32 %v3655_v62, %v2717_v63  ;;  %v3835_v47 = vld [vmem:[#allocation5 + $0x7cc] sm:$0xf]  ;;  %v3437_v48 = vld [vmem:[#allocation5 + $0x7d8] sm:$0xf0] }
  0xe2   :  { %1985 = vmatpush.bf16.msra.mxu1 %v2656_v0  ;;  %1998 = vmatpush.bf16.msra.mxu2 %v2784_v1  ;;  %v3687_v0 = vld [vmem:[#allocation5 + $0x32c] sm:$0xf]  ;;  %v2845_v1 = vld [vmem:[#allocation5 + $0x338] sm:$0xf0]  ;;  %v3440_v56 = vor.u32 %v3835_v47, %v3437_v48 }
  0xe3   :  { %2011 = vmatpush.bf16.msra.mxu3 %v2912_v5  ;;  %v2592_v5 = vor.u32 %v3623_v58, %v2589_v61  ;;  %v3735_v53 = vld [vmem:[#allocation5 + $0x4ac] sm:$0xf]  ;;  %v3165_v57 = vld [vmem:[#allocation5 + $0x5b8] sm:$0xf0] }
  0xe4   :  { %1973 = vmatpush.bf16.msra.mxu0 %v2512_v11  ;;  %v1747_v10 = vpop.f32.mrf.mxu2  ;;  %v2848_v11 = vor.u32 %v3687_v0, %v2845_v1  ;;  %v3799_v58 = vld [vmem:[#allocation5 + $0x6ac] sm:$0xf]  ;;  %v3293_v59 = vld [vmem:[#allocation5 + $0x6b8] sm:$0xf0] }
  0xe5   :  { %v3421_v61 = vld [vmem:[#allocation5 + $0x7b8] sm:$0xf0]  ;;  %v3296_v0 = vor.u32 %v3799_v58, %v3293_v59  ;;  %v3731_v1 = vld [vmem:[#allocation5 + $0x48c] sm:$0xf]  ;;  %v343_v58 = vperm.slane %v4103_v26, 1 }
  0xe6   :  { %1986 = vmatpush.bf16.msra.mxu1 %v2640_v13  ;;  %1999 = vmatpush.bf16.msra.mxu2 %v2768_v14  ;;  %v3683_v13 = vld [vmem:[#allocation5 + $0x30c] sm:$0xf]  ;;  %v2829_v14 = vld [vmem:[#allocation5 + $0x318] sm:$0xf0] }
  0xe7   :  { %2012 = vmatpush.bf16.msra.mxu3 %v2896_v25  ;;  %v1760_v15 = vpop.f32.mrf.mxu3  ;;  %v3197_v25 = vld [vmem:[#allocation5 + $0x5f8] sm:$0xf0]  ;;  %v3827_v7 = vld [vmem:[#allocation5 + $0x78c] sm:$0xf] }
  0xe8   :  { %1974 = vmatpush.bf16.msra.mxu0 %v2496_v33  ;;  %v2832_v33 = vor.u32 %v3683_v13, %v2829_v14  ;;  %v3149_v4 = vld [vmem:[#allocation5 + $0x598] sm:$0xf0]  ;;  %v3727_v10 = vld [vmem:[#allocation5 + $0x46c] sm:$0xf] }
  0xe9   :  { %v3759_v12 = vld [vmem:[#allocation5 + $0x56c] sm:$0xf]  ;;  %v3133_v15 = vld [vmem:[#allocation5 + $0x578] sm:$0xf0] }
  0xea   :  { %1987 = vmatpush.bf16.msra.mxu1 %v2624_v34  ;;  %2000 = vmatpush.bf16.msra.mxu2 %v2752_v35  ;;  %v3072_v34 = vor.u32 %v3743_v16, %v3069_v17  ;;  %v3200_v35 = vor.u32 %v3775_v21, %v3197_v25  ;;  %v3791_v16 = vld [vmem:[#allocation5 + $0x66c] sm:$0xf]  ;;  %v3261_v17 = vld [vmem:[#allocation5 + $0x678] sm:$0xf0]  ;;  %v3136_v27 = vor.u32 %v3759_v12, %v3133_v15  ;;  %v3848_v15 = vld [vmem:[#allocation8 + $0x30] sm:$0xff] }
  0xeb   :  { %2013 = vmatpush.bf16.msra.mxu3 %v2880_v24  ;;  %v3456_v24 = vor.u32 %v3839_v31, %v3453_v32  ;;  %v3823_v21 = vld [vmem:[#allocation5 + $0x76c] sm:$0xf]  ;;  %v3264_v28 = vor.u32 %v3791_v16, %v3261_v17  ;;  %v3373_v40 = vld [vmem:[#allocation5 + $0x758] sm:$0xf0] }
  0xec   :  { %1975 = vmatpush.bf16.msra.mxu0 %v2480_v51  ;;  %v3312_v51 = vor.u32 %v3803_v45, %v3309_v46  ;;  %v3755_v31 = vld [vmem:[#allocation5 + $0x54c] sm:$0xf]  ;;  %v2973_v48 = vld [vmem:[#allocation5 + $0x438] sm:$0xf0] }
  0xed   :  { %v3819_v39 = vld [vmem:[#allocation5 + $0x74c] sm:$0xf]  ;;  %v3857_v12 = vld [vmem:[#allocation8 + $0x78] sm:$0xff] }
  0xee   :  { %1988 = vmatpush.bf16.msra.mxu1 %v2608_v54  ;;  %2001 = vmatpush.bf16.msra.mxu2 %v2736_v55  ;;  %v3037_v54 = vld [vmem:[#allocation5 + $0x4b8] sm:$0xf0]  ;;  %v3767_v55 = vld [vmem:[#allocation5 + $0x5ac] sm:$0xf] }
  0xef   :  { %2014 = vmatpush.bf16.msra.mxu3 %v2864_v60  ;;  %v3831_v60 = vld [vmem:[#allocation5 + $0x7ac] sm:$0xf]  ;;  %v3040_v62 = vor.u32 %v3735_v53, %v3037_v54  ;;  %v3168_v63 = vor.u32 %v3767_v55, %v3165_v57  ;;  %v3101_v53 = vld [vmem:[#allocation5 + $0x538] sm:$0xf0] }
  0xf0   :  { %1976 = vmatpush.bf16.msra.mxu0 %v2464_v2  ;;  %v3021_v2 = vld [vmem:[#allocation5 + $0x498] sm:$0xf0]  ;;  %v3424_v3 = vor.u32 %v3831_v60, %v3421_v61  ;;  %v3719_v47 = vld [vmem:[#allocation5 + $0x42c] sm:$0xf] }
  0xf1   :  { %v3783_v54 = vld [vmem:[#allocation5 + $0x62c] sm:$0xf]  ;;  %v3229_v55 = vld [vmem:[#allocation5 + $0x638] sm:$0xf0]  ;;  %v2976_v59 = vor.u32 %v3719_v47, %v2973_v48 }
  0xf2   :  { %1989 = vmatpush.bf16.msra.mxu1 %v2592_v5  ;;  %2002 = vmatpush.bf16.msra.mxu2 %v2720_v6  ;;  %v3795_v5 = vld [vmem:[#allocation5 + $0x68c] sm:$0xf]  ;;  %v3277_v6 = vld [vmem:[#allocation5 + $0x698] sm:$0xf0]  ;;  %v3232_v61 = vor.u32 %v3783_v54, %v3229_v55 }
  0xf3   :  { %2015 = vmatpush.bf16.msra.mxu3 %v2848_v11  ;;  %v3280_v9 = vor.u32 %v3795_v5, %v3277_v6  ;;  %v3005_v11 = vld [vmem:[#allocation5 + $0x478] sm:$0xf0]  ;;  %v3811_v6 = vld [vmem:[#allocation5 + $0x70c] sm:$0xf] }
  0xf4   :  { %1977 = vmatpush.bf16.msra.mxu0 %v2448_v23  ;;  %v4119_v8 = vpop.f32.mrf.mxu0  ;;  %v3389_v23 = vld [vmem:[#allocation5 + $0x778] sm:$0xf0]  ;;  %v3008_v25 = vor.u32 %v3727_v10, %v3005_v11 }
  0xf5   :  { %v3357_v57 = vld [vmem:[#allocation5 + $0x738] sm:$0xf0] }
  0xf6   :  { %1990 = vmatpush.bf16.msra.mxu1 %v2576_v29  ;;  %2003 = vmatpush.bf16.msra.mxu2 %v2704_v30  ;;  %v4121_v13 = vpop.f32.mrf.mxu1  ;;  %v3723_v29 = vld [vmem:[#allocation5 + $0x44c] sm:$0xf]  ;;  %v2989_v30 = vld [vmem:[#allocation5 + $0x458] sm:$0xf0] }
  0xf7   :  { %2016 = vmatpush.bf16.msra.mxu3 %v2832_v33  ;;  %1978 = vmatmul.bf16.vlgmr.msra.gmra.mxu0 %v4069_v19  ;;  %v3405_v19 = vld [vmem:[#allocation5 + $0x798] sm:$0xf0]  ;;  %v3392_v33 = vor.u32 %v3823_v21, %v3389_v23  ;;  %v3855_v23 = vld [vmem:[#allocation8 + $0x68] sm:$0xff] }
  0xf8   :  { %2022 = vmatpush.bf16.msrb.mxu0 %v3072_v34  ;;  %v3408_v14 = vor.u32 %v3827_v7, %v3405_v19  ;;  %v3117_v34 = vld [vmem:[#allocation5 + $0x558] sm:$0xf0]  ;;  %v1772_v19 = vadd.f32 %v4119_v8, %v343_v58  ;;  %v3856_v8 = vld [vmem:[#allocation8 + $0x70] sm:$0xff] }
  0xf9   :  { %2004 = vmatmul.bf16.vlgmr.msra.gmra.mxu2 %v4067_v18  ;;  %1991 = vmatmul.bf16.vlgmr.msra.gmra.mxu1 %v4073_v22  ;;  %v3763_v18 = vld [vmem:[#allocation5 + $0x58c] sm:$0xf]  ;;  %v3120_v45 = vor.u32 %v3755_v31, %v3117_v34  ;;  %v3341_v7 = vld [vmem:[#allocation5 + $0x718] sm:$0xf0]  ;;  %v3844_v34 = vld [vmem:[#allocation8 + $0x10] sm:$0xff] }
  0xfa   :  { %2035 = vmatpush.bf16.msrb.mxu1 %v3200_v35  ;;  %2048 = vmatpush.bf16.msrb.mxu2 %v3328_v36  ;;  %v3152_v22 = vor.u32 %v3763_v18, %v3149_v4  ;;  %v3787_v35 = vld [vmem:[#allocation5 + $0x64c] sm:$0xf]  ;;  %v3245_v36 = vld [vmem:[#allocation5 + $0x658] sm:$0xf0]  ;;  %v3344_v10 = vor.u32 %v3811_v6, %v3341_v7  ;;  %v3860_v58 = vld [vmem:[#allocation8 + $0x90] sm:$0xff] }
  0xfb   :  { %2061 = vmatpush.bf16.msrb.mxu3 %v3456_v24  ;;  %v2992_v24 = vor.u32 %v3723_v29, %v2989_v30  ;;  %v3248_v46 = vor.u32 %v3787_v35, %v3245_v36  ;;  %v3085_v18 = vld [vmem:[#allocation5 + $0x518] sm:$0xf0]  ;;  %v3864_v30 = vld [vmem:[#allocation8 + $0xb0] sm:$0xff] }
  0xfc   :  { %2017 = vmatmul.bf16.vlgmr.msra.gmra.mxu3 %v4071_v20  ;;  %2023 = vmatpush.bf16.msrb.mxu0 %v3056_v49  ;;  %v3024_v20 = vor.u32 %v3731_v1, %v3021_v2  ;;  %v4123_v32 = vpop.f32.mrf.mxu2  ;;  %v1773_v43 = vpop.f32.mrf.mxu0  ;;  %v3751_v49 = vld [vmem:[#allocation5 + $0x52c] sm:$0xf]  ;;  %v3213_v4 = vld [vmem:[#allocation5 + $0x618] sm:$0xf0] }
  0xfd   :  { %v3104_v60 = vor.u32 %v3751_v49, %v3101_v53  ;;  %v3849_v11 = vld [vmem:[#allocation8 + $0x38] sm:$0xff]  ;;  %v3843_v43 = vld [vmem:[#allocation8 + $0x8] sm:$0xff]  ;;  %v3850_v53 = vld [vmem:[#allocation8 + $0x40] sm:$0xff] }
  0xfe   :  { %2036 = vmatpush.bf16.msrb.mxu1 %v3184_v50  ;;  %2049 = vmatpush.bf16.msrb.mxu2 %v3312_v51  ;;  %v1786_v50 = vpop.f32.mrf.mxu1  ;;  %v3376_v51 = vor.u32 %v3819_v39, %v3373_v40  ;;  %v3865_v16 = vld [vmem:[#allocation8 + $0xb8] sm:$0xff]  ;;  %v3852_v39 = vld [vmem:[#allocation8 + $0x50] sm:$0xff] }
  0xff   :  { %2062 = vmatpush.bf16.msrb.mxu3 %v3440_v56  ;;  %v4125_v37 = vpop.f32.mrf.mxu3  ;;  %v3815_v56 = vld [vmem:[#allocation5 + $0x72c] sm:$0xf]  ;;  %v3842_v50 = vld [vmem:[#allocation8] sm:$0xff] }
 0x100   :  { %2024 = vmatpush.bf16.msrb.mxu0 %v3040_v62  ;;  %v3715_v62 = vld [vmem:[#allocation5 + $0x40c] sm:$0xf]  ;;  %v3360_v2 = vor.u32 %v3815_v56, %v3357_v57 }
 0x102   :  { %2037 = vmatpush.bf16.msrb.mxu1 %v3168_v63  ;;  %2050 = vmatpush.bf16.msrb.mxu2 %v3296_v0  ;;  %v2957_v63 = vld [vmem:[#allocation5 + $0x418] sm:$0xf0]  ;;  %v3747_v0 = vld [vmem:[#allocation5 + $0x50c] sm:$0xf] }
 0x103   :  { %2063 = vmatpush.bf16.msrb.mxu3 %v3424_v3  ;;  %v3779_v3 = vld [vmem:[#allocation5 + $0x60c] sm:$0xf] }
 0x104   :  { %2025 = vmatpush.bf16.msrb.mxu0 %v3024_v20  ;;  %v1799_v1 = vpop.f32.mrf.mxu2  ;;  %v2960_v20 = vor.u32 %v3715_v62, %v2957_v63 }
 0x106   :  { %2038 = vmatpush.bf16.msrb.mxu1 %v3152_v22  ;;  %2051 = vmatpush.bf16.msrb.mxu2 %v3280_v9  ;;  %v3088_v22 = vor.u32 %v3747_v0, %v3085_v18  ;;  %v3216_v9 = vor.u32 %v3779_v3, %v3213_v4  ;;  %v3858_v0 = vld [vmem:[#allocation8 + $0x80] sm:$0xff] }
 0x107   :  { %2064 = vmatpush.bf16.msrb.mxu3 %v3408_v14  ;;  %v1812_v5 = vpop.f32.mrf.mxu3  ;;  %v1785_v14 = vadd.f32 %v4121_v13, %v1772_v19  ;;  %v3847_v13 = vld [vmem:[#allocation8 + $0x28] sm:$0xff] }
 0x108   :  { %2026 = vmatpush.bf16.msrb.mxu0 %v3008_v25  ;;  %v3846_v25 = vld [vmem:[#allocation8 + $0x20] sm:$0xff] }
 0x109   :  { %v1798_v17 = vadd.f32 %v4123_v32, %v1785_v14 }
 0x10a   :  { %2039 = vmatpush.bf16.msrb.mxu1 %v3136_v27  ;;  %2052 = vmatpush.bf16.msrb.mxu2 %v3264_v28 }
 0x10b   :  { %2065 = vmatpush.bf16.msrb.mxu3 %v3392_v33  ;;  %v1811_v21 = vadd.f32 %v4125_v37, %v1798_v17  ;;  %v3863_v33 = vld [vmem:[#allocation8 + $0xa8] sm:$0xff]  ;;  %v3862_v37 = vld [vmem:[#allocation8 + $0xa0] sm:$0xff] }
 0x10c   :  { %2027 = vmatpush.bf16.msrb.mxu0 %v2992_v24 }
 0x10e   :  { %2040 = vmatpush.bf16.msrb.mxu1 %v3120_v45  ;;  %2053 = vmatpush.bf16.msrb.mxu2 %v3248_v46  ;;  %v3861_v45 = vld [vmem:[#allocation8 + $0x98] sm:$0xff]  ;;  %v3851_v46 = vld [vmem:[#allocation8 + $0x48] sm:$0xff] }
 0x10f   :  { %2066 = vmatpush.bf16.msrb.mxu3 %v3376_v51  ;;  %v2074_v51 = vmax.f32 %v4113_v52, 0.0  ;;  %v344_v52 = vperm.slane %v4103_v26, 2 }
 0x110   :  { %2028 = vmatpush.bf16.msrb.mxu0 %v2976_v59 }
 0x111   :  { %v2078_v55 = vpack.c.bf16 %v2074_v51, %v2074_v51 }
 0x112   :  { %2041 = vmatpush.bf16.msrb.mxu1 %v3104_v60  ;;  %2054 = vmatpush.bf16.msrb.mxu2 %v3232_v61  ;;  %v3859_v61 = vld [vmem:[#allocation8 + $0x88] sm:$0xff] }
 0x113   :  { %2067 = vmatpush.bf16.msrb.mxu3 %v3360_v2 }
 0x114   :  { %2029 = vmatpush.bf16.msrb.mxu0 %v2960_v20  ;;  %v1823_v27 = vpop.f32.mrf.mxu0 }
 0x115   :  { %v1824_v28 = vadd.f32 %v1823_v27, %v1811_v21  ;;  %v3869_v27 = vld [vmem:[#allocation8 + $0xd8] sm:$0xff] }
 0x116   :  { %2042 = vmatpush.bf16.msrb.mxu1 %v3088_v22  ;;  %2055 = vmatpush.bf16.msrb.mxu2 %v3216_v9  ;;  %v1836_v29 = vpop.f32.mrf.mxu1 }
 0x117   :  { %2068 = vmatpush.bf16.msrb.mxu3 %v3344_v10  ;;  %2030 = vmatmul.bf16.vlgmr.msrb.gmra.mxu0 %v4081_v41  ;;  %v3854_v41 = vld [vmem:[#allocation8 + $0x60] sm:$0xff] }
 0x118   :  { %2342 = vmatpush.bf16.msra.mxu0 %v3849_v11  ;;  %v3873_v11 = vld [vmem:[#allocation8 + $0xf8] sm:$0xff] }
 0x119   :  { %2043 = vmatmul.bf16.vlgmr.msrb.gmra.mxu1 %v4085_v44  ;;  %2056 = vmatmul.bf16.vlgmr.msrb.gmra.mxu2 %v4079_v38  ;;  %v3845_v38 = vld [vmem:[#allocation8 + $0x18] sm:$0xff]  ;;  %v1837_v44 = vadd.f32 %v1836_v29, %v1824_v28 }
 0x11a   :  { %2355 = vmatpush.bf16.msra.mxu1 %v3857_v12  ;;  %2069 = vmatmul.bf16.vlgmr.msrb.gmra.mxu3 %v4083_v42  ;;  %v3853_v42 = vld [vmem:[#allocation8 + $0x58] sm:$0xff] }
 0x11b   :  { %2368 = vmatpush.bf16.msra.mxu2 %v3865_v16  ;;  %2381 = vmatpush.bf16.msra.mxu3 %v3873_v11 }
 0x11c   :  { %2343 = vmatpush.bf16.msra.mxu0 %v3848_v15  ;;  %v1849_v31 = vpop.f32.mrf.mxu2  ;;  %v1825_v36 = vpop.f32.mrf.mxu0  ;;  %v3872_v15 = vld [vmem:[#allocation8 + $0xf0] sm:$0xff] }
 0x11d   :  { %v1850_v35 = vadd.f32 %v1849_v31, %v1837_v44  ;;  %v3866_v31 = vld [vmem:[#allocation8 + $0xc0] sm:$0xff] }
 0x11e   :  { %2356 = vmatpush.bf16.msra.mxu1 %v3856_v8  ;;  %v1838_v40 = vpop.f32.mrf.mxu1 }
 0x11f   :  { %2369 = vmatpush.bf16.msra.mxu2 %v3864_v30  ;;  %v1862_v32 = vpop.f32.mrf.mxu3  ;;  %2382 = vmatpush.bf16.msra.mxu3 %v3872_v15  ;;  %v3867_v30 = vld [vmem:[#allocation8 + $0xc8] sm:$0xff] }
 0x120   :  { %2344 = vmatpush.bf16.msra.mxu0 %v3847_v13  ;;  %v1863_v24 = vadd.f32 %v1862_v32, %v1850_v35  ;;  %v3871_v13 = vld [vmem:[#allocation8 + $0xe8] sm:$0xff] }
 0x122   :  { %2357 = vmatpush.bf16.msra.mxu1 %v3855_v23  ;;  %v2075_v49 = vmax.f32 %v1863_v24, 0.0 }
 0x123   :  { %2370 = vmatpush.bf16.msra.mxu2 %v3863_v33  ;;  %2383 = vmatpush.bf16.msra.mxu3 %v3871_v13  ;;  %v345_v33 = vperm.slane %v4103_v26, 3 }
 0x124   :  { %2345 = vmatpush.bf16.msra.mxu0 %v3846_v25  ;;  %v1851_v47 = vpop.f32.mrf.mxu2  ;;  %v2079_v54 = vpack.c.bf16 %v2075_v49, %v2075_v49  ;;  %v3870_v25 = vld [vmem:[#allocation8 + $0xe0] sm:$0xff] }
 0x126   :  { %2358 = vmatpush.bf16.msra.mxu1 %v3854_v41  ;;  %v3868_v41 = vld [vmem:[#allocation8 + $0xd0] sm:$0xff] }
 0x127   :  { %2371 = vmatpush.bf16.msra.mxu2 %v3862_v37  ;;  %v1864_v48 = vpop.f32.mrf.mxu3  ;;  %2384 = vmatpush.bf16.msra.mxu3 %v3870_v25 }
 0x128   :  { %2346 = vmatpush.bf16.msra.mxu0 %v3845_v38 }
 0x12a   :  { %2359 = vmatpush.bf16.msra.mxu1 %v3853_v42 }
 0x12b   :  { %2372 = vmatpush.bf16.msra.mxu2 %v3861_v45  ;;  %2385 = vmatpush.bf16.msra.mxu3 %v3869_v27 }
 0x12c   :  { %2347 = vmatpush.bf16.msra.mxu0 %v3844_v34 }
 0x12e   :  { %2360 = vmatpush.bf16.msra.mxu1 %v3852_v39 }
 0x12f   :  { %2373 = vmatpush.bf16.msra.mxu2 %v3860_v58  ;;  %2386 = vmatpush.bf16.msra.mxu3 %v3868_v41 }
 0x130   :  { %2348 = vmatpush.bf16.msra.mxu0 %v3843_v43 }
 0x132   :  { %2361 = vmatpush.bf16.msra.mxu1 %v3851_v46 }
 0x133   :  { %2374 = vmatpush.bf16.msra.mxu2 %v3859_v61  ;;  %2387 = vmatpush.bf16.msra.mxu3 %v3867_v30 }
 0x134   :  { %2349 = vmatpush.bf16.msra.mxu0 %v3842_v50  ;;  %v1875_v56 = vpop.f32.mrf.mxu0 }
 0x135   :  { %v1876_v18 = vadd.f32 %v1875_v56, %v344_v52 }
 0x136   :  { %2362 = vmatpush.bf16.msra.mxu1 %v3850_v53  ;;  %v1888_v57 = vpop.f32.mrf.mxu1 }
 0x137   :  { %2350 = vmatmul.bf16.vlgmr.msra.gmra.mxu0 %v2078_v55  ;;  %2375 = vmatpush.bf16.msra.mxu2 %v3858_v0  ;;  %v1889_v3 = vadd.f32 %v1888_v57, %v1876_v18  ;;  %v3883_v57 = vld [vmem:[%s4149_s4] ss:$0 sm:$0xff]  ;;  %s4024_s4 = smov [#allocation10]  }
 0x138   :  { %2388 = vmatpush.bf16.msra.mxu3 %v3866_v31  ;;  %s2419_s15 = sshll.u32 %s4024_s4, 4  ;;  %s2420_s15 = int_to_ptr.vmem [resolvable:$true] %s2419_s15 }
 0x139   :  { %2363 = vmatmul.bf16.vlgmr.msra.gmra.mxu1 %v2079_v54 }
 0x13c   :  { %v1901_v59 = vpop.f32.mrf.mxu2  ;;  %v1877_v62 = vpop.f32.mrf.mxu0 }
 0x13d   :  { %v1902_v4 = vadd.f32 %v1901_v59, %v1889_v3 }
 0x13e   :  { %v1890_v63 = vpop.f32.mrf.mxu1 }
 0x13f   :  { %v1914_v60 = vpop.f32.mrf.mxu3 }
 0x140   :  { %v1915_v5 = vadd.f32 %v1914_v60, %v1902_v4 }
 0x144   :  { %v1903_v1 = vpop.f32.mrf.mxu2 }
 0x147   :  { %v1916_v2 = vpop.f32.mrf.mxu3 }
 0x154   :  { %v1927_v6 = vpop.f32.mrf.mxu0 }
 0x155   :  { %v1928_v7 = vadd.f32 %v1927_v6, %v1915_v5 }
 0x156   :  { %v1940_v19 = vpop.f32.mrf.mxu1 }
 0x157   :  { %v1941_v20 = vadd.f32 %v1940_v19, %v1928_v7 }
 0x15c   :  { %v1953_v22 = vpop.f32.mrf.mxu2  ;;  %v1929_v14 = vpop.f32.mrf.mxu0 }
 0x15d   :  { %v1954_v9 = vadd.f32 %v1953_v22, %v1941_v20 }
 0x15e   :  { %v1942_v16 = vpop.f32.mrf.mxu1 }
 0x15f   :  { %v1966_v10 = vpop.f32.mrf.mxu3 }
 0x160   :  { %v1967_v12 = vadd.f32 %v1966_v10, %v1954_v9 }
 0x162   :  { %v2076_v8 = vmax.f32 %v1967_v12, 0.0 }
 0x164   :  { %v2080_v17 = vpack.c.bf16 %v2076_v8, %v2076_v8  ;;  %v1955_v21 = vpop.f32.mrf.mxu2 }
 0x166   :  { %2376 = vmatmul.bf16.vlgmr.msra.gmra.mxu2 %v2080_v17 }
 0x167   :  { %v1968_v23 = vpop.f32.mrf.mxu3 }
 0x174   :  { %v1979_v28 = vpop.f32.mrf.mxu0 }
 0x175   :  { %v1980_v36 = vadd.f32 %v1979_v28, %v345_v33 }
 0x176   :  { %v1992_v29 = vpop.f32.mrf.mxu1 }
 0x177   :  { %v1993_v37 = vadd.f32 %v1992_v29, %v1980_v36 }
 0x17c   :  { %v2005_v38 = vpop.f32.mrf.mxu2  ;;  %v1981_v42 = vpop.f32.mrf.mxu0 }
 0x17d   :  { %v2006_v39 = vadd.f32 %v2005_v38, %v1993_v37 }
 0x17e   :  { %v1994_v32 = vpop.f32.mrf.mxu1 }
 0x17f   :  { %v2018_v44 = vpop.f32.mrf.mxu3 }
 0x180   :  { %v2019_v40 = vadd.f32 %v2018_v44, %v2006_v39 }
 0x184   :  { %v2007_v34 = vpop.f32.mrf.mxu2 }
 0x187   :  { %v2020_v35 = vpop.f32.mrf.mxu3 }
 0x194   :  { %v2031_v24 = vpop.f32.mrf.mxu0 }
 0x195   :  { %v2032_v45 = vadd.f32 %v2031_v24, %v2019_v40 }
 0x196   :  { %v2044_v43 = vpop.f32.mrf.mxu1 }
 0x197   :  { %v2045_v46 = vadd.f32 %v2044_v43, %v2032_v45 }
 0x19c   :  { %v2057_v47 = vpop.f32.mrf.mxu2  ;;  %v2033_v50 = vpop.f32.mrf.mxu0 }
 0x19d   :  { %v2058_v48 = vadd.f32 %v2057_v47, %v2045_v46  ;;  %v2070_v49 = vpop.f32.mrf.mxu3 }
 0x19e   :  { %v2046_v51 = vpop.f32.mrf.mxu1 }
 0x19f   :  { %v2071_v53 = vadd.f32 %v2070_v49, %v2058_v48 }
 0x1a1   :  { %v2077_v54 = vmax.f32 %v2071_v53, 0.0 }
 0x1a3   :  { %v2081_v55 = vpack.c.bf16 %v2077_v54, %v2077_v54 }
 0x1a4   :  { %v2059_v56 = vpop.f32.mrf.mxu2 }
 0x1a5   :  { %v2072_v26 = vpop.f32.mrf.mxu3  ;;  %2389 = vmatmul.bf16.vlgmr.msra.gmra.mxu3 %v2081_v55 }
 0x1b4   :  { %v2351_v58 = vpop.f32.mrf.mxu0 }
 0x1b5   :  { %v2352_v59 = vadd.f32 %v3883_v57, %v2351_v58 }
 0x1b6   :  { %v2364_v60 = vpop.f32.mrf.mxu1 }
 0x1b7   :  { %v2365_v61 = vadd.f32 %v2364_v60, %v2352_v59 }
 0x1bc   :  { %v2353_v62 = vpop.f32.mrf.mxu0 }
 0x1be   :  { %v2366_v63 = vpop.f32.mrf.mxu1 }
 0x1e9   :  { %v2377_v0 = vpop.f32.mrf.mxu2 }
 0x1ea   :  { %v2378_v1 = vadd.f32 %v2377_v0, %v2365_v61 }
 0x1f1   :  { %v2379_v52 = vpop.f32.mrf.mxu2 }
 0x228   :  { %v2390_v2 = vpop.f32.mrf.mxu3 }
 0x229   :  { %v2391_v18 = vadd.f32 %v2390_v2, %v2378_v1 }
 0x22b   :  { %v3585_v3 = vmul.f32 -1.442695, %v2391_v18 }
 0x22d   :  { %3884 = vpow2.f32 %v3585_v3 }
 0x230   :  { %v2392_v4 = vpop.f32.mrf.mxu3 }
 0x233   :  { %v3885_v5 = vpop.eup %3884 }
 0x234   :  { %v2397_v6 = vadd.f32 1.0, %v3885_v5 }
 0x236   :  { %3886 = vrcp.f32 %v2397_v6  ;;  %v2409_v22 = vand.u32 2147483648, %v2397_v6  ;;  %v2407_v10 = vand.u32 2147483647, %v2397_v6  ;;  %vm2403_vm1 = vweird.f32 %v2397_v6 }
 0x238   :  { %v2410_v12 = vor.u32 1.1754944e-38, %v2409_v22  ;;  %vm2408_vm3 = vcmp.eq.f32.partialorder %v2407_v10, 8.507059e+37 }
 0x23c   :  { %v3887_v7 = vpop.eup %3886 }
 0x23d   :  { %v2399_v19 = vmul.f32 %v3887_v7, %v2397_v6  ;;  %vm2404_vm0 = vweird.f32 %v3887_v7 }
 0x23e   :  { %vm2405_vm2 = vmor %vm2403_vm1, %vm2404_vm0 }
 0x23f   :  { %v2400_v20 = vsub.f32 1.0, %v2399_v19 }
 0x241   :  { %v2401_v9 = vmul.f32 %v3887_v7, %v2400_v20 }
 0x243   :  { %v2402_v11 = vadd.f32 %v3887_v7, %v2401_v9 }
 0x245   :  { %v2406_v14 = vsel %vm2405_vm2, %v3887_v7, %v2402_v11 }
 0x246   :  { %v2411_v15 = vsel %vm2408_vm3, %v2410_v12, %v2406_v14 }
 0x247   :  { %2413 = vst [vmem:[#allocation10] sm:$0xff] %v2411_v15 }
 0x248   :  { %2424 = dma.vmem_to_hbm [thread:$0]  %s2420_s15, 128, %s2422_s18, [#allocation4]  }
 0x249   :  { %4014 = dma.done.wait [#allocation4], 128  }
 0x24a   :  { %4015 = vsyncadd [#allocation4], 4294967168 }
 0x24b   :  { %2429 = vsyncpa [#allocation3], 1 }
 0x24c   :  { %2430 = vsyncpa [#allocation6], 1 }
 0x24d   :  { %2431 = vsyncpa [#allocation9], 1 }
 0x24e   :  { %2432 = vsyncpa [#allocation4], 1 }

</bundles_post_ra>
